<compile_context>
chip_gen: v6e
topology: v6e:2x2x1
jax: 0.10.0
libtpu: 0.0.40
codegen_flags: <defaults>
</compile_context>

<pallas_src>
import functools

import jax
import jax.numpy as jnp
from jax.experimental import pallas as pl
from jax.experimental.pallas import tpu as pltpu


def _round_up(x: int, m: int) -> int:
    return ((x + m - 1) // m) * m


def _feature_multiple() -> int:
    """Lane-padding multiple for feature dims: 256 on v6e/v7x (2x256^2 MXU),
    128 on older parts (128-wide MXU)."""
    try:
        kind = jax.devices()[0].device_kind.lower()
    except Exception:
        return 128
    for old in ("v2", "v3", "v4", "v5"):
        if old in kind:
            return 128
    return 256


def _vmem_budget_bytes() -> int:
    """~75% of physical VMEM per TensorCore (headroom for spills / internal
    scratch). Falls back to a 48 MiB budget, safe on every generation."""
    try:
        cap = int(pltpu.get_tpu_info().vmem_capacity_bytes)
    except Exception:
        cap = 64 << 20
    return (cap * 3) // 4


def _pick_batch_tile(batch: int, tile_b: int) -> int:
    """Batch tile: multiple of 16 (bf16 sublane pack), snapped to 128/256 when
    large, capped at ceil(B/2) so the grid has >= 2 steps (v7x megacore)."""
    cap = max(16, _round_up((batch + 1) // 2, 16))
    tb = max(16, min(int(tile_b), cap))
    if tb >= 256:
        tb -= tb % 256
    elif tb >= 128:
        tb -= tb % 128
    else:
        tb = min(_round_up(tb, 16), cap)
    return tb


def _pad_cast_2d(a, rows: int, cols: int, dtype):
    a = jnp.asarray(a)
    if a.ndim == 1:           # tolerate torch-style 1-D biases
        a = a[None, :]
    if a.shape == (rows, cols) and a.dtype == jnp.dtype(dtype):
        return a
    return jnp.pad(a, ((0, rows - a.shape[0]), (0, cols - a.shape[1]))).astype(dtype)


def prepare_params(params, *, compute_dtype=jnp.bfloat16, feature_mult=None):
    """One-time pad + cast of the weights/biases (hoisted out of the per-call
    path). Zero padding preserves the math exactly: padded input columns hit
    zero weight rows, padded hidden/output columns get zero weights + zero
    bias, and ReLU keeps them at zero."""
    if feature_mult is None:
        feature_mult = _feature_multiple()
    in_dim, hid = params["w1"].shape
    out_dim = params["w3"].shape[1]
    in_p = _round_up(in_dim, feature_mult)
    hid_p = _round_up(hid, feature_mult)
    out_p = _round_up(out_dim, feature_mult)
    return {
        "_prepared": True,
        "compute_dtype": jnp.dtype(compute_dtype),
        "dims": (in_dim, hid, out_dim),
        "padded_dims": (in_p, hid_p, out_p),
        "w1": _pad_cast_2d(params["w1"], in_p, hid_p, compute_dtype),
        "w2": _pad_cast_2d(params["w2"], hid_p, hid_p, compute_dtype),
        "w3": _pad_cast_2d(params["w3"], hid_p, out_p, compute_dtype),
        "b1": _pad_cast_2d(params["b1"], 1, hid_p, jnp.float32),
        "b2": _pad_cast_2d(params["b2"], 1, hid_p, jnp.float32),
        "b3": _pad_cast_2d(params["b3"], 1, out_p, jnp.float32),
    }


def mlp_kernel(x_ref, w1_ref, b1_ref, w2_ref, b2_ref, w3_ref, b3_ref, o_ref,
               *, mm_dtype):
    # fc1 -> ReLU -> fc2 -> ReLU -> fc3, fused per batch tile. Matmuls run on
    # the MXU in mm_dtype with f32 accumulation; bias-add / ReLU stay in f32.
    x = x_ref[...]                                              # (tb, in_p)

    h1 = jnp.dot(x, w1_ref[...], preferred_element_type=jnp.float32)
    h1 = jnp.maximum(h1 + b1_ref[...], 0.0)

    h2 = jnp.dot(h1.astype(mm_dtype), w2_ref[...],
                 preferred_element_type=jnp.float32)
    h2 = jnp.maximum(h2 + b2_ref[...], 0.0)

    out = jnp.dot(h2.astype(mm_dtype), w3_ref[...],
                  preferred_element_type=jnp.float32)
    o_ref[...] = (out + b3_ref[...]).astype(o_ref.dtype)


def mlp_forward(x, params, *, tile_b=512, compute_dtype=jnp.bfloat16,
                out_dtype=jnp.float32):
    """x: (B, input_size). params: raw {"w1","b1",...} (weights stored (in, out))
    or, preferably, the output of prepare_params() so the pad/cast HBM pass is
    paid once instead of per forward."""
    if not params.get("_prepared", False):
        params = prepare_params(params, compute_dtype=compute_dtype)
    mm_dtype = params["compute_dtype"]
    in_dim, hid, out_dim = params["dims"]
    in_p, hid_p, out_p = params["padded_dims"]

    B = x.shape[0]
    assert x.shape[1] == in_dim, (x.shape, in_dim)

    tb = _pick_batch_tile(B, tile_b)
    b_p = _round_up(B, tb)
    grid = (b_p // tb,)

    # Pad / cast x only when actually needed (skips an activation HBM pass).
    if x.shape == (b_p, in_p) and x.dtype == mm_dtype:
        x_p = x
    else:
        x_p = jnp.pad(x, ((0, b_p - B), (0, in_p - in_dim))).astype(mm_dtype)

    # Grid-invariant operands: whole array resident in VMEM, single-buffered;
    # only x / out tiles are pipelined over the batch grid.
    resident = pl.BlockSpec(memory_space=pltpu.MemorySpace.VMEM)

    mm_bytes = jnp.dtype(mm_dtype).itemsize
    out_bytes = jnp.dtype(out_dtype).itemsize
    w_bytes = (in_p * hid_p + hid_p * hid_p + hid_p * out_p) * mm_bytes
    bias_bytes = (2 * hid_p + out_p) * 4
    est = (w_bytes + bias_bytes
           + 2 * tb * in_p * mm_bytes          # double-buffered x tiles
           + 2 * tb * out_p * out_bytes        # double-buffered out tiles
           + 3 * tb * hid_p * 4)               # f32 h1/h2 intermediates + slack
    budget = _vmem_budget_bytes()
    vmem_limit = int(min(budget, max(32 << 20, 2 * est)))
    # TODO(synk): when est exceeds ~60% of budget, switch to the hidden-split
    # path described at the top of the file instead of fully-resident weights.

    cost = pl.CostEstimate(
        flops=2 * b_p * (in_p * hid_p + hid_p * hid_p + hid_p * out_p),
        transcendentals=0,
        bytes_accessed=(b_p * in_p * mm_bytes + w_bytes + bias_bytes
                        + b_p * out_p * out_bytes),
    )

    out = pl.pallas_call(
        functools.partial(mlp_kernel, mm_dtype=mm_dtype),
        out_shape=jax.ShapeDtypeStruct((b_p, out_p), out_dtype),
        grid_spec=pltpu.PrefetchScalarGridSpec(
            num_scalar_prefetch=0,
            grid=grid,
            in_specs=[
                pl.BlockSpec((tb, in_p), lambda i: (i, 0)),   # x: pipelined tiles
                resident, resident,                           # w1, b1
                resident, resident,                           # w2, b2
                resident, resident,                           # w3, b3
            ],
            out_specs=pl.BlockSpec((tb, out_p), lambda i: (i, 0)),
        ),
        compiler_params=pltpu.CompilerParams(
            dimension_semantics=(pltpu.PARALLEL,),
            vmem_limit_bytes=vmem_limit,
        ),
        cost_estimate=cost,
    )(x_p, params["w1"], params["b1"], params["w2"], params["b2"],
      params["w3"], params["b3"])

    # Strip batch / lane padding (skip when already exact).
    if out.shape == (B, out_dim):
        return out
    return out[:B, :out_dim]


def init_params(key, input_size, hidden_size, output_size):
    """Deterministic synthetic init (uniform, like torch Linear's default range)."""
    ks = jax.random.split(key, 6)

    def linear(kw, kb, fan_in, fan_out):
        bound = 1.0 / jnp.sqrt(fan_in)
        # stored as (in, out) so the kernel can do x @ W directly
        w = jax.random.uniform(kw, (fan_in, fan_out), jnp.float32, -bound, bound)
        b = jax.random.uniform(kb, (1, fan_out), jnp.float32, -bound, bound)
        return w, b

    w1, b1 = linear(ks[0], ks[1], input_size, hidden_size)
    w2, b2 = linear(ks[2], ks[3], hidden_size, hidden_size)
    w3, b3 = linear(ks[4], ks[5], hidden_size, output_size)
    return {"w1": w1, "b1": b1, "w2": w2, "b2": b2, "w3": w3, "b3": b3}


def mlp_reference(x, p):
    h1 = jnp.maximum(x @ p["w1"] + p["b1"], 0.0)
    h2 = jnp.maximum(h1 @ p["w2"] + p["b2"], 0.0)
    return h2 @ p["w3"] + p["b3"]


if __name__ == "__main__":
    key = jax.random.PRNGKey(0)
    k_x, k_p = jax.random.split(key)

    # Small demo shapes; batch chosen so the grid has >= 2 steps (exercises
    # pipelining and the v7x two-TensorCore sharding via the ceil(B/2) cap).
    batch, input_size, hidden_size, output_size = 256, 32, 32, 16

    x = jax.random.normal(k_x, (batch, input_size), jnp.float32)
    params = init_params(k_p, input_size, hidden_size, output_size)
    ref = mlp_reference(x, params)

    # f32 matmul-operand path (tolerance covers MXU f32 accumulation order).
    prep_f32 = prepare_params(params, compute_dtype=jnp.float32)
    out_f32 = jax.block_until_ready(mlp_forward(x, prep_f32, tile_b=128))
    assert out_f32.shape == (batch, output_size)
    assert jnp.allclose(out_f32, ref, atol=1e-3, rtol=1e-3), "f32 path mismatch"

    # Fast path: bf16 MXU operands, f32 accumulation, params prepared ONCE.
    prep_bf16 = prepare_params(params, compute_dtype=jnp.bfloat16)
    out = jax.block_until_ready(mlp_forward(x, prep_bf16))
    assert out.shape == (batch, output_size)
    max_err = float(jnp.max(jnp.abs(out - ref)))
    assert max_err < 5e-2, f"bf16 path mismatch: max abs err {max_err}"

    # bf16 output variant (halves writeback; for consumers that accept bf16).
    out_bf16 = jax.block_until_ready(
        mlp_forward(x, prep_bf16, out_dtype=jnp.bfloat16))
    assert out_bf16.shape == (batch, output_size)
    assert out_bf16.dtype == jnp.bfloat16
    max_err_b = float(jnp.max(jnp.abs(out_bf16.astype(jnp.float32) - ref)))
    assert max_err_b < 1e-1, f"bf16-out path mismatch: max abs err {max_err_b}"

    print("KERNEL_OK")
</pallas_src>

<mosaic_0001>
module attributes {stable_mosaic.version = 11 : i64} {
  func.func @mlp_kernel(%arg0: i32, %arg1: memref<128x256xf32, #tpu.memory_space<vmem>>, %arg2: memref<256x256xf32, #tpu.memory_space<vmem>>, %arg3: memref<1x256xf32, #tpu.memory_space<vmem>>, %arg4: memref<256x256xf32, #tpu.memory_space<vmem>>, %arg5: memref<1x256xf32, #tpu.memory_space<vmem>>, %arg6: memref<256x256xf32, #tpu.memory_space<vmem>>, %arg7: memref<1x256xf32, #tpu.memory_space<vmem>>, %arg8: memref<128x256xf32, #tpu.memory_space<vmem>>) attributes {dimension_semantics = [#tpu.dimension_semantics<parallel>], iteration_bounds = array<i64: 2>, scalar_prefetch = 0 : i64, scratch_operands = 0 : i64, tpu.core_type = #tpu.core_type<tc>, window_params = [{transform_indices = @transform_0, window_bounds = array<i64: 128, 256>}, {pipeline_mode = #tpu.pipeline_mode<synchronous>, transform_indices = @transform_1, window_bounds = array<i64: 256, 256>}, {pipeline_mode = #tpu.pipeline_mode<synchronous>, transform_indices = @transform_2, window_bounds = array<i64: 1, 256>}, {pipeline_mode = #tpu.pipeline_mode<synchronous>, transform_indices = @transform_3, window_bounds = array<i64: 256, 256>}, {pipeline_mode = #tpu.pipeline_mode<synchronous>, transform_indices = @transform_4, window_bounds = array<i64: 1, 256>}, {pipeline_mode = #tpu.pipeline_mode<synchronous>, transform_indices = @transform_5, window_bounds = array<i64: 256, 256>}, {pipeline_mode = #tpu.pipeline_mode<synchronous>, transform_indices = @transform_6, window_bounds = array<i64: 1, 256>}, {transform_indices = @transform_7, window_bounds = array<i64: 128, 256>}]} {
    %c0 = arith.constant 0 : index
    %c0_0 = arith.constant 0 : index
    %0 = vector.load %arg1[%c0, %c0_0] : memref<128x256xf32, #tpu.memory_space<vmem>>, vector<128x256xf32>
    %c0_1 = arith.constant 0 : index
    %c0_2 = arith.constant 0 : index
    %1 = vector.load %arg2[%c0_1, %c0_2] : memref<256x256xf32, #tpu.memory_space<vmem>>, vector<256x256xf32>
    %cst = arith.constant dense<0.000000e+00> : vector<128x256xf32>
    %2 = tpu.matmul %0, %1, %cst {dimension_numbers = #tpu.dot_dimension_numbers<[1], [0], [0], [1], [0, 0, 1, 1], [], []>} : vector<128x256xf32>, vector<256x256xf32>, vector<128x256xf32> -> vector<128x256xf32>
    %c0_3 = arith.constant 0 : index
    %c0_4 = arith.constant 0 : index
    %3 = vector.load %arg3[%c0_3, %c0_4] : memref<1x256xf32, #tpu.memory_space<vmem>>, vector<1x256xf32>
    %4 = vector.broadcast %3 : vector<1x256xf32> to vector<128x256xf32>
    %5 = arith.addf %2, %4 : vector<128x256xf32>
    %cst_5 = arith.constant 0.000000e+00 : f32
    %6 = vector.broadcast %cst_5 : f32 to vector<128x256xf32>
    %7 = arith.maximumf %5, %6 : vector<128x256xf32>
    %c0_6 = arith.constant 0 : index
    %c0_7 = arith.constant 0 : index
    %8 = vector.load %arg4[%c0_6, %c0_7] : memref<256x256xf32, #tpu.memory_space<vmem>>, vector<256x256xf32>
    %cst_8 = arith.constant dense<0.000000e+00> : vector<128x256xf32>
    %9 = tpu.matmul %7, %8, %cst_8 {dimension_numbers = #tpu.dot_dimension_numbers<[1], [0], [0], [1], [0, 0, 1, 1], [], []>} : vector<128x256xf32>, vector<256x256xf32>, vector<128x256xf32> -> vector<128x256xf32>
    %c0_9 = arith.constant 0 : index
    %c0_10 = arith.constant 0 : index
    %10 = vector.load %arg5[%c0_9, %c0_10] : memref<1x256xf32, #tpu.memory_space<vmem>>, vector<1x256xf32>
    %11 = vector.broadcast %10 : vector<1x256xf32> to vector<128x256xf32>
    %12 = arith.addf %9, %11 : vector<128x256xf32>
    %cst_11 = arith.constant 0.000000e+00 : f32
    %13 = vector.broadcast %cst_11 : f32 to vector<128x256xf32>
    %14 = arith.maximumf %12, %13 : vector<128x256xf32>
    %c0_12 = arith.constant 0 : index
    %c0_13 = arith.constant 0 : index
    %15 = vector.load %arg6[%c0_12, %c0_13] : memref<256x256xf32, #tpu.memory_space<vmem>>, vector<256x256xf32>
    %cst_14 = arith.constant dense<0.000000e+00> : vector<128x256xf32>
    %16 = tpu.matmul %14, %15, %cst_14 {dimension_numbers = #tpu.dot_dimension_numbers<[1], [0], [0], [1], [0, 0, 1, 1], [], []>} : vector<128x256xf32>, vector<256x256xf32>, vector<128x256xf32> -> vector<128x256xf32>
    %c0_15 = arith.constant 0 : index
    %c0_16 = arith.constant 0 : index
    %17 = vector.load %arg7[%c0_15, %c0_16] : memref<1x256xf32, #tpu.memory_space<vmem>>, vector<1x256xf32>
    %18 = vector.broadcast %17 : vector<1x256xf32> to vector<128x256xf32>
    %19 = arith.addf %16, %18 : vector<128x256xf32>
    %c0_17 = arith.constant 0 : index
    %c0_18 = arith.constant 0 : index
    %20 = vector.load %arg8[%c0_17, %c0_18] : memref<128x256xf32, #tpu.memory_space<vmem>>, vector<128x256xf32>
    tpu.vector_store %arg8[%c0_17, %c0_18], %19 {strides = array<i32>} : memref<128x256xf32, #tpu.memory_space<vmem>>, vector<128x256xf32>,
    return
  }
  func.func @transform_0(%arg0: i32) -> (i32, i32) {
    %c0_i32 = arith.constant 0 : i32
    %c0_i32_0 = arith.constant 0 : i32
    return %arg0, %c0_i32 : i32, i32
  }
  func.func @transform_1(%arg0: i32) -> (i32, i32) {
    %c0_i32 = arith.constant 0 : i32
    %c0_i32_0 = arith.constant 0 : i32
    %c0_i32_1 = arith.constant 0 : i32
    return %c0_i32, %c0_i32_0 : i32, i32
  }
  func.func @transform_2(%arg0: i32) -> (i32, i32) {
    %c0_i32 = arith.constant 0 : i32
    %c0_i32_0 = arith.constant 0 : i32
    %c0_i32_1 = arith.constant 0 : i32
    return %c0_i32, %c0_i32_0 : i32, i32
  }
  func.func @transform_3(%arg0: i32) -> (i32, i32) {
    %c0_i32 = arith.constant 0 : i32
    %c0_i32_0 = arith.constant 0 : i32
    %c0_i32_1 = arith.constant 0 : i32
    return %c0_i32, %c0_i32_0 : i32, i32
  }
  func.func @transform_4(%arg0: i32) -> (i32, i32) {
    %c0_i32 = arith.constant 0 : i32
    %c0_i32_0 = arith.constant 0 : i32
    %c0_i32_1 = arith.constant 0 : i32
    return %c0_i32, %c0_i32_0 : i32, i32
  }
  func.func @transform_5(%arg0: i32) -> (i32, i32) {
    %c0_i32 = arith.constant 0 : i32
    %c0_i32_0 = arith.constant 0 : i32
    %c0_i32_1 = arith.constant 0 : i32
    return %c0_i32, %c0_i32_0 : i32, i32
  }
  func.func @transform_6(%arg0: i32) -> (i32, i32) {
    %c0_i32 = arith.constant 0 : i32
    %c0_i32_0 = arith.constant 0 : i32
    %c0_i32_1 = arith.constant 0 : i32
    return %c0_i32, %c0_i32_0 : i32, i32
  }
  func.func @transform_7(%arg0: i32) -> (i32, i32) {
    %c0_i32 = arith.constant 0 : i32
    %c0_i32_0 = arith.constant 0 : i32
    return %arg0, %c0_i32 : i32, i32
  }
}

</mosaic_0001>

<bundles_post_ra>
// kernel: tpu_custom_call.1
= control target key start
LH: loop header
LB: loop body
LE: loop exit
PB: predicated region body
PF: predicated region fallthrough
CT: control target
= control target key end

     0   :  { %s2332_s0 = inlined_call_operand.hbm [shape: f32[256,256], index: 0, kind: input, shape index: {}]   ;;  %s2333_s1 = inlined_call_operand.hbm [shape: f32[256,256], index: 1, kind: input, shape index: {}]   ;;  %s2334_s2 = inlined_call_operand.vmem [shape: f32[1,256], index: 2, kind: input, shape index: {}]   ;;  %s2335_s3 = inlined_call_operand.hbm [shape: f32[256,256], index: 3, kind: input, shape index: {}]   ;;  %s2336_s4 = inlined_call_operand.vmem [shape: f32[1,256], index: 4, kind: input, shape index: {}]   ;;  %s2337_s5 = inlined_call_operand.hbm [shape: f32[256,256], index: 5, kind: input, shape index: {}]   ;;  %s2338_s6 = inlined_call_operand.vmem [shape: f32[1,256], index: 6, kind: input, shape index: {}]   ;;  %s2339_s7 = inlined_call_operand.hbm [shape: f32[256,256], index: 7, kind: output, shape index: {}]  }
   0x1   :  { %2357 = sst [smem:[#allocation24_spill]] %s2333_s1 }
   0x2   :  { %12 = vsyncpa [#allocation3], 0 }
   0x3   :  { %14 = vsyncpa [#allocation3 + $0x1], 0 }
   0x4   :  { %15 = vsyncpa [#allocation6], 0 }
   0x5   :  { %16 = vsyncpa [#allocation9], 0 }
   0x6   :  { %17 = vsyncpa [#allocation4], 0 }
   0x7   :  { %19 = vsyncpa [#allocation4 + $0x1], 0  ;;  %s1700_s24 = smov 0   ;;  %s1702_s25 = smov 0  }
   0x8   :  { %s1704_s26 = smov 0   ;;  %s1706_s27 = smov 0  }
   0x9 LB: > { %s1721_s28 = sadd.s32 4294967295, %s1649_s27   ;;  %s1300_s29 = sadd.s32 4294967294, %s1649_s27   ;;  %s1649_s27 = sphi %s1706_s27, %s2397_s27   ;;  %s1645_s26 = sphi %s1704_s26, %s2396_s26   ;;  %s1641_s25 = sphi %s1702_s25, %s2395_s25   ;;  %s1637_s24 = sphi %s1700_s24, %s2394_s24  }
   0xa   : > { %p45_p0 = scmp.ne.s32.totalorder %s1641_s25, %s1637_s24  ;;  %p2340_p1 = scmp.eq.s32.totalorder %s1721_s28, 0 }
   0xb   : > { %p195_p2 = scmp.eq.s32.totalorder %s1721_s28, 1  ;;  %p201_p3 = scmp.eq.s32.totalorder %s1300_s29, 1 }
   0xc   : > { %p1730_p4 = por %p2340_p1, %p45_p0  ;;  %p1301_p5 = scmp.ge.s32.totalorder %s1649_s27, 1 }
   0xd   : > { %p1735_p6 = por %p201_p3, %p45_p0  ;;  %p208_p7 = scmp.lt.s32.totalorder %s1649_s27, 3 }
   0xe   : > { %s2358_s30 = scalar_select %p1730_p4, 1, 0 }
   0xf   : > { %s2359_s8 = scalar_select %p1735_p6, 1, 0 }
  0x10   : > { %p1740_p8 = pnand %p1301_p5, %p208_p7  ;;  %s1651_s10 = smov [#allocation5]  }
  0x11   : > { %s220_s11 = sshll.u32 %s1651_s10, 4  ;;  %s1652_s13 = smov [#allocation7]   ;;  %s221_s11 = int_to_ptr.vmem [resolvable:$true] %s220_s11 }
  0x12   : > { %s2360_s9 = scalar_select %p1740_p8, 1, 0 }
  0x13   : > { %p1406_p9 = pneg %p1740_p8  ;;  %s236_s14 = sshll.u32 %s1652_s13, 4  ;;  %s237_s14 = int_to_ptr.vmem [resolvable:$true] %s236_s14 }
  0x14   : > { %s1653_s15 = smov [#allocation8]   ;;  %s1482_s17 = scalar_lea.vmem %s221_s11, 8192 }
  0x15   : > { %p1749_p11 = pnand %p1406_p9, %p2340_p1  ;;  %s252_s16 = sshll.u32 %s1653_s15, 4  ;;  %s253_s16 = int_to_ptr.vmem [resolvable:$true] %s252_s16 }
  0x16   : > { %p1483_p13 = scmp.ne.s32.totalorder %s221_s11, %s1482_s17  ;;  %p1490_p5 = scmp.lt.s32.totalorder %s221_s11, %s221_s11 }
  0x17   : > { %p1473_p12 = pneg %p1749_p11  ;;  %p1491_p7 = scmp.lt.s32.totalorder %s1482_s17, %s1482_s17 }
  0x19   : > { %p1485_p0 = pnand %p1483_p13, %p1473_p12  ;;  %p1492_p9 = por %p1491_p7, %p1490_p5 }
  0x1b   : > { %p1486_p3 = pneg %p1485_p0 }
  0x1d   : > { %p1493_p10 = pnand %p1492_p9, %p1486_p3 }
  0x1f   : > { %1496 = shalt.err (!%p1493_p10)
}
  0x20   : > { %s2341_s18 = smov 256   ;;  %s2342_s19 = smov 16  }
  0x21   : > { %s2362_s1 = sld [smem:[#allocation24_spill]]  ;;  %s1508_s22 = scalar_lea.vmem %s237_s14, 8192 }
  0x22   : > { %p1509_p13 = scmp.ne.s32.totalorder %s237_s14, %s1508_s22  ;;  %p1516_p3 = scmp.lt.s32.totalorder %s237_s14, %s237_s14 }
  0x23   : > { %p1517_p10 = scmp.lt.s32.totalorder %s1508_s22, %s1508_s22 }
  0x24   : > { %p1511_p0 = pnand %p1509_p13, %p1473_p12 }
  0x25   : > { %p1518_p7 = por %p1517_p10, %p1516_p3 }
  0x26   : > { %p1512_p5 = pneg %p1511_p0 }
  0x27   : > { %1409 = dma.hbm_to_vmem [thread:$0]  (!%p1749_p11), %s2362_s1, 8192, %s221_s11, [#allocation6], %s2341_s18, %s2341_s18, %s2342_s19  }
  0x28   : > { %p1519_p9 = pnand %p1518_p7, %p1512_p5 }
  0x2a   : > { %1522 = shalt.err (!%p1519_p9)
}
  0x2b   : > { %1412 = dma.hbm_to_vmem [thread:$0]  (!%p1749_p11), %s2335_s3, 8192, %s237_s14, [#allocation6], %s2341_s18, %s2341_s18, %s2342_s19  }
  0x2c   : > { %s1534_s10 = scalar_lea.vmem %s253_s16, 8192  ;;  %p1542_p3 = scmp.lt.s32.totalorder %s253_s16, %s253_s16 }
  0x2d   : > { %p1535_p1 = scmp.ne.s32.totalorder %s253_s16, %s1534_s10  ;;  %p1543_p5 = scmp.lt.s32.totalorder %s1534_s10, %s1534_s10 }
  0x2f   : > { %p1537_p13 = pnand %p1535_p1, %p1473_p12  ;;  %p1544_p10 = por %p1543_p5, %p1542_p3 }
  0x31   : > { %p1538_p0 = pneg %p1537_p13 }
  0x33   : > { %p1545_p7 = pnand %p1544_p10, %p1538_p0 }
  0x35   : > { %1548 = shalt.err (!%p1545_p7)
}
  0x36   : > { %1415 = dma.hbm_to_vmem [thread:$0]  (!%p1749_p11), %s2337_s5, 8192, %s253_s16, [#allocation9], %s2341_s18, %s2341_s18, %s2342_s19  }
  0x37   : > { %s1789_s14 = sadd.s32 1, %s1649_s27   ;;  %s32_s15 = sadd.s32 1, %s1645_s26 }
  0x38   : > { %s29_s12 = ssub.s32 %s1649_s27, %s1789_s14  ;;  %p39_p12 = scmp.ne.s32.totalorder %s1645_s26, %s1641_s25 }
  0x39   : > { %p30_p1 = scmp.eq.s32.totalorder %s29_s12, 0  ;;  %p40_p9 = scmp.eq.s32.totalorder %s1649_s27, 0 }
  0x3a   : > { %p1427_p13 = scmp.lt.s32.totalorder %s1649_s27, 2  ;;  %p1803_p3 = por %p195_p2, %p39_p12 }
  0x3b   : > { %s1799_s17 = scalar_select %p30_p1, %s1645_s26, %s32_s15  }
  0x3c   : > { %p41_p0 = por %p40_p9, %p39_p12  ;;  %s269_s21 = sand.u32 1, %s1645_s26  }
  0x3d   : > { %s2363_s20 = scalar_select %p1803_p3, 1, 0 }
  0x3e   : > { %s1323_s22 = sshll.u32 %s1649_s27, 12  ;;  %s1306_s16 = sshll.u32 %s269_s21, 8 }
  0x3f   : > { %s1812_s10 = scalar_lea.hbm %s2332_s0, %s1323_s22  ;;  %s273_s11 = scalar_lea.vmem [#allocation2], %s1306_s16 }
  0x40   : > { %s281_s13 = sshll.u32 %s273_s11, 4  ;;  %p1814_p11 = pnand %p1427_p13, %p41_p0  ;;  %s1818_s13 = int_to_ptr.vmem [resolvable:$true] %s281_s13 }
  0x41   : > { %s1820_s15 = scalar_lea.sflag [#allocation3], %s269_s21  ;;  %s1549_s18 = scalar_lea.hbm %s1812_s10, 4096 }
  0x42   : > { %p1550_p2 = scmp.ne.s32.totalorder %s1812_s10, %s1549_s18  ;;  %p1551_p5 = pneg %p1814_p11 }
  0x43   : > { %s1554_s16 = scalar_lea.hbm %s2332_s0, 8192  ;;  %p1555_p1 = scmp.lt.s32.totalorder %s1812_s10, %s2332_s0 }
  0x44   : > { %p1552_p10 = pnand %p1551_p5, %p1550_p2  ;;  %p1556_p12 = scmp.lt.s32.totalorder %s1554_s16, %s1549_s18 }
  0x46   : > { %p1553_p7 = pneg %p1552_p10  ;;  %p1557_p9 = por %p1556_p12, %p1555_p1 }
  0x48   : > { %p1558_p13 = pnand %p1557_p9, %p1553_p7 }
  0x4a   : > { %1561 = shalt.err (!%p1558_p13)
}
  0x4b   : > { %s1562_s21 = scalar_lea.vmem %s1818_s13, 4096  ;;  %s1656_s19 = smov [#allocation2]  }
  0x4c   : > { %p1563_p0 = scmp.ne.s32.totalorder %s1818_s13, %s1562_s21  ;;  %s1567_s1 = sshll.u32 %s1656_s19, 4  ;;  %s1568_s1 = int_to_ptr.vmem [resolvable:$false] %s1567_s1 }
  0x4d   : > { %s1569_s22 = scalar_lea.vmem %s1568_s1, 8192  ;;  %p1570_p10 = scmp.lt.s32.totalorder %s1818_s13, %s1568_s1 }
  0x4e   : > { %p1565_p6 = pnand %p1563_p0, %p1551_p5  ;;  %p1571_p3 = scmp.lt.s32.totalorder %s1569_s22, %s1562_s21 }
  0x50   : > { %p1566_p2 = pneg %p1565_p6  ;;  %p1572_p4 = por %p1571_p3, %p1570_p10 }
  0x52   : > { %p1573_p8 = pnand %p1572_p4, %p1566_p2 }
  0x54   : > { %1576 = shalt.err (!%p1573_p8)
}
  0x55   : > { %s2365_s18 = smov 16   ;;  %s2366_s23 = smov 256  }
  0x56   : > { %1419 = dma.hbm_to_vmem [thread:$0]  (!%p1814_p11), %s1812_s10, 4096, %s1818_s13, %s1820_s15, %s2366_s23, %s2366_s23, %s2365_s18  }
  0x57   : > { %p2367_p6 = scmp.ne.s32.totalorder %s2360_s9, 0 }
  0x59   : > { %293 = sbr.rel (%p2367_p6) target bundleno = 841 (0x349), region = 48 }
  0x5e   : > { %s1847_s19 = sand.u32 1, %s1641_s25   ;;  %p2368_p4 = scmp.ne.s32.totalorder %s2358_s30, 0 }
  0x5f   : > { %s1311_s1 = sshll.u32 %s1847_s19, 8  ;;  %s296_s16 = scalar_lea.sflag [#allocation3], %s1847_s19 }
  0x60   : > { %s1853_s12 = scalar_lea.vmem [#allocation2], %s1311_s1 }
  0x61   : > { %1620 = dma.done.wait (%p2368_p4), %s296_s16, 4096  }
  0x62   : > { %1622 = vsyncadd (%p2368_p4), %s296_s16, 4294963200  ;;  %p2369_p8 = scmp.eq.s32.totalorder %s1721_s28, 0 }
  0x64   : > { %1624 = dma.done.wait (%p2369_p8), [#allocation6], 16384   ;;  %p2370_p3 = pmov %p2369_p8 }
  0x66   : > { %1626 = vsyncadd (%p2370_p3), [#allocation6], 4294950912  ;;  %p2371_p11 = pmov %p2370_p3 }
  0x67   : > { %p2372_p5 = pmov %p2370_p3 }
  0x68   : > { %1628 = dma.done.wait (%p2371_p11), [#allocation9], 8192  }
  0x69   : > { %1630 = vsyncadd (%p2372_p5), [#allocation9], 4294959104  ;;  %v407_v0 = vld [vmem:[#allocation5 + $0xf8] sm:$0xff]  ;;  %v406_v1 = vld [vmem:[#allocation5 + $0xf0] sm:$0xff]  ;;  %s2217_s11 = scalar_lea.vmem [#allocation10], %s1311_s1  ;;  %s1325_s21 = sshll.u32 %s1721_s28, 12 }
  0x6a   : > { %v405_v2 = vld [vmem:[#allocation5 + $0xe8] sm:$0xff]  ;;  %452 = vmatprep.subr.mxu0 %v407_v0  ;;  %v404_v3 = vld [vmem:[#allocation5 + $0xe0] sm:$0xff]  ;;  %v403_v4 = vld [vmem:[#allocation5 + $0xd8] sm:$0xff]  ;;  %s1198_s22 = sshll.u32 %s2217_s11, 4  ;;  %s2284_s1 = scalar_lea.hbm %s2339_s7, %s1325_s21  ;;  %s2286_s22 = int_to_ptr.vmem [resolvable:$true] %s1198_s22 }
  0x6b   : > { %453 = vmatpush1.msra.mxu0 %v406_v1  ;;  %v402_v5 = vld [vmem:[#allocation5 + $0xd0] sm:$0xff]  ;;  %v401_v6 = vld [vmem:[#allocation5 + $0xc8] sm:$0xff]  ;;  %v400_v7 = vld [vmem:[#allocation5 + $0xc0] sm:$0xff]  ;;  %s1184_s28 = scalar_lea.sflag [#allocation4], %s1847_s19  ;;  %s1577_s16 = scalar_lea.vmem %s2286_s22, 4096 }
  0x6c   : > { %454 = vmatprep.subr.mxu0 %v405_v2  ;;  %v399_v8 = vld [vmem:[#allocation5 + $0xb8] sm:$0xff]  ;;  %v398_v9 = vld [vmem:[#allocation5 + $0xb0] sm:$0xff]  ;;  %v397_v10 = vld [vmem:[#allocation5 + $0xa8] sm:$0xff]  ;;  %p1578_p7 = scmp.ne.s32.totalorder %s2286_s22, %s1577_s16  ;;  %p2391_p1 = scmp.ne.s32.totalorder %s2363_s20, 0 }
  0x6d   : > { %455 = vmatpush1.msra.mxu0 %v404_v3  ;;  %v396_v11 = vld [vmem:[#allocation5 + $0xa0] sm:$0xff]  ;;  %v395_v12 = vld [vmem:[#allocation5 + $0x98] sm:$0xff]  ;;  %v394_v13 = vld [vmem:[#allocation5 + $0x90] sm:$0xff] }
  0x6e   : > { %456 = vmatprep.subr.mxu0 %v403_v4  ;;  %v393_v14 = vld [vmem:[#allocation5 + $0x88] sm:$0xff]  ;;  %v392_v15 = vld [vmem:[#allocation5 + $0x80] sm:$0xff]  ;;  %v391_v16 = vld [vmem:[#allocation5 + $0x78] sm:$0xff]  ;;  %p1579_p12 = pnand %p1578_p7, %p2391_p1 }
  0x6f   : > { %457 = vmatpush1.msra.mxu0 %v402_v5  ;;  %v390_v17 = vld [vmem:[#allocation5 + $0x70] sm:$0xff]  ;;  %v389_v18 = vld [vmem:[#allocation5 + $0x68] sm:$0xff]  ;;  %v388_v19 = vld [vmem:[#allocation5 + $0x60] sm:$0xff] }
  0x70   : > { %458 = vmatprep.subr.mxu0 %v401_v6  ;;  %v387_v20 = vld [vmem:[#allocation5 + $0x58] sm:$0xff]  ;;  %v386_v21 = vld [vmem:[#allocation5 + $0x50] sm:$0xff]  ;;  %v385_v22 = vld [vmem:[#allocation5 + $0x48] sm:$0xff]  ;;  %p1580_p9 = pneg %p1579_p12 }
  0x71   : > { %459 = vmatpush1.msra.mxu0 %v400_v7  ;;  %v384_v23 = vld [vmem:[#allocation5 + $0x40] sm:$0xff]  ;;  %v345_v24 = vld [vmem:[%s1853_s12 + $0x8] sm:$0xff]  ;;  %v383_v25 = vld [vmem:[#allocation5 + $0x38] sm:$0xff] }
  0x72   : > { %460 = vmatprep.subr.mxu0 %v399_v8  ;;  %516 = vmatprep.mubr.f32.mxu0 %v345_v24  ;;  %v382_v26 = vld [vmem:[#allocation5 + $0x30] sm:$0xff]  ;;  %v381_v27 = vld [vmem:[#allocation5 + $0x28] sm:$0xff]  ;;  %v380_v28 = vld [vmem:[#allocation5 + $0x20] sm:$0xff] }
  0x73   : > { %461 = vmatpush1.msra.mxu0 %v398_v9  ;;  %v379_v29 = vld [vmem:[#allocation5 + $0x18] sm:$0xff]  ;;  %v378_v30 = vld [vmem:[#allocation5 + $0x10] sm:$0xff]  ;;  %v377_v31 = vld [vmem:[#allocation5 + $0x8] sm:$0xff] }
  0x74   : > { %462 = vmatprep.subr.mxu0 %v397_v10  ;;  %v376_v32 = vld [vmem:[#allocation5] sm:$0xff]  ;;  %v439_v33 = vld [vmem:[#allocation5 + $0x1f8] sm:$0xff]  ;;  %v438_v34 = vld [vmem:[#allocation5 + $0x1f0] sm:$0xff] }
  0x75   : > { %463 = vmatpush1.msra.mxu0 %v396_v11  ;;  %v437_v35 = vld [vmem:[#allocation5 + $0x1e8] sm:$0xff]  ;;  %v676_v36 = vld [vmem:[#allocation7 + $0xf8] sm:$0xff]  ;;  %v675_v37 = vld [vmem:[#allocation7 + $0xf0] sm:$0xff] }
  0x76   : > { %464 = vmatprep.subr.mxu0 %v395_v12  ;;  %v674_v38 = vld [vmem:[#allocation7 + $0xe8] sm:$0xff]  ;;  %v436_v39 = vld [vmem:[#allocation5 + $0x1e0] sm:$0xff]  ;;  %721 = vmatprep.subr.mxu1 %v676_v36  ;;  %v435_v41 = vld [vmem:[#allocation5 + $0x1d8] sm:$0xff] }
  0x77   : > { %465 = vmatpush1.msra.mxu0 %v394_v13  ;;  %v673_v40 = vld [vmem:[#allocation7 + $0xe0] sm:$0xff]  ;;  %722 = vmatpush1.msra.mxu1 %v675_v37  ;;  %v672_v42 = vld [vmem:[#allocation7 + $0xd8] sm:$0xff]  ;;  %v434_v43 = vld [vmem:[#allocation5 + $0x1d0] sm:$0xff] }
  0x78   : > { %466 = vmatprep.subr.mxu0 %v393_v14  ;;  %723 = vmatprep.subr.mxu1 %v674_v38  ;;  %v671_v44 = vld [vmem:[#allocation7 + $0xd0] sm:$0xff]  ;;  %v433_v45 = vld [vmem:[#allocation5 + $0x1c8] sm:$0xff]  ;;  %v432_v47 = vld [vmem:[#allocation5 + $0x1c0] sm:$0xff] }
  0x79   : > { %467 = vmatpush1.msra.mxu0 %v392_v15  ;;  %724 = vmatpush1.msra.mxu1 %v673_v40  ;;  %v670_v46 = vld [vmem:[#allocation7 + $0xc8] sm:$0xff]  ;;  %v669_v48 = vld [vmem:[#allocation7 + $0xc0] sm:$0xff]  ;;  %v431_v49 = vld [vmem:[#allocation5 + $0x1b8] sm:$0xff] }
  0x7a   : > { %468 = vmatprep.subr.mxu0 %v391_v16  ;;  %725 = vmatprep.subr.mxu1 %v672_v42  ;;  %v668_v50 = vld [vmem:[#allocation7 + $0xb8] sm:$0xff]  ;;  %v430_v51 = vld [vmem:[#allocation5 + $0x1b0] sm:$0xff]  ;;  %v429_v53 = vld [vmem:[#allocation5 + $0x1a8] sm:$0xff] }
  0x7b   : > { %469 = vmatpush1.msra.mxu0 %v390_v17  ;;  %726 = vmatpush1.msra.mxu1 %v671_v44  ;;  %v667_v52 = vld [vmem:[#allocation7 + $0xb0] sm:$0xff]  ;;  %v666_v54 = vld [vmem:[#allocation7 + $0xa8] sm:$0xff]  ;;  %v428_v55 = vld [vmem:[#allocation5 + $0x1a0] sm:$0xff] }
  0x7c   : > { %470 = vmatprep.subr.mxu0 %v389_v18  ;;  %727 = vmatprep.subr.mxu1 %v670_v46  ;;  %v665_v56 = vld [vmem:[#allocation7 + $0xa0] sm:$0xff]  ;;  %v427_v57 = vld [vmem:[#allocation5 + $0x198] sm:$0xff]  ;;  %v426_v59 = vld [vmem:[#allocation5 + $0x190] sm:$0xff] }
  0x7d   : > { %471 = vmatpush1.msra.mxu0 %v388_v19  ;;  %728 = vmatpush1.msra.mxu1 %v669_v48  ;;  %v664_v58 = vld [vmem:[#allocation7 + $0x98] sm:$0xff]  ;;  %v663_v60 = vld [vmem:[#allocation7 + $0x90] sm:$0xff]  ;;  %v425_v61 = vld [vmem:[#allocation5 + $0x188] sm:$0xff] }
  0x7e   : > { %472 = vmatprep.subr.mxu0 %v387_v20  ;;  %729 = vmatprep.subr.mxu1 %v668_v50  ;;  %v662_v62 = vld [vmem:[#allocation7 + $0x88] sm:$0xff]  ;;  %v424_v63 = vld [vmem:[#allocation5 + $0x180] sm:$0xff]  ;;  %v423_v1 = vld [vmem:[#allocation5 + $0x178] sm:$0xff] }
  0x7f   : > { %473 = vmatpush1.msra.mxu0 %v386_v21  ;;  %730 = vmatpush1.msra.mxu1 %v667_v52  ;;  %v661_v0 = vld [vmem:[#allocation7 + $0x80] sm:$0xff]  ;;  %v660_v2 = vld [vmem:[#allocation7 + $0x78] sm:$0xff]  ;;  %v422_v3 = vld [vmem:[#allocation5 + $0x170] sm:$0xff] }
  0x80   : > { %474 = vmatprep.subr.mxu0 %v385_v22  ;;  %731 = vmatprep.subr.mxu1 %v666_v54  ;;  %v659_v4 = vld [vmem:[#allocation7 + $0x70] sm:$0xff]  ;;  %v421_v5 = vld [vmem:[#allocation5 + $0x168] sm:$0xff]  ;;  %v420_v7 = vld [vmem:[#allocation5 + $0x160] sm:$0xff] }
  0x81   : > { %475 = vmatpush1.msra.mxu0 %v384_v23  ;;  %732 = vmatpush1.msra.mxu1 %v665_v56  ;;  %v658_v6 = vld [vmem:[#allocation7 + $0x68] sm:$0xff]  ;;  %v657_v8 = vld [vmem:[#allocation7 + $0x60] sm:$0xff]  ;;  %v419_v9 = vld [vmem:[#allocation5 + $0x158] sm:$0xff] }
  0x82   : > { %476 = vmatprep.subr.mxu0 %v383_v25  ;;  %733 = vmatprep.subr.mxu1 %v664_v58  ;;  %v656_v10 = vld [vmem:[#allocation7 + $0x58] sm:$0xff]  ;;  %v418_v11 = vld [vmem:[#allocation5 + $0x150] sm:$0xff]  ;;  %v417_v13 = vld [vmem:[#allocation5 + $0x148] sm:$0xff] }
  0x83   : > { %477 = vmatpush1.msra.mxu0 %v382_v26  ;;  %734 = vmatpush1.msra.mxu1 %v663_v60  ;;  %v655_v12 = vld [vmem:[#allocation7 + $0x50] sm:$0xff]  ;;  %v654_v14 = vld [vmem:[#allocation7 + $0x48] sm:$0xff]  ;;  %v416_v15 = vld [vmem:[#allocation5 + $0x140] sm:$0xff] }
  0x84   : > { %478 = vmatprep.subr.mxu0 %v381_v27  ;;  %735 = vmatprep.subr.mxu1 %v662_v62  ;;  %v653_v16 = vld [vmem:[#allocation7 + $0x40] sm:$0xff]  ;;  %v415_v17 = vld [vmem:[#allocation5 + $0x138] sm:$0xff]  ;;  %v414_v19 = vld [vmem:[#allocation5 + $0x130] sm:$0xff] }
  0x85   : > { %479 = vmatpush1.msra.mxu0 %v380_v28  ;;  %736 = vmatpush1.msra.mxu1 %v661_v0  ;;  %v652_v18 = vld [vmem:[#allocation7 + $0x38] sm:$0xff]  ;;  %v651_v20 = vld [vmem:[#allocation7 + $0x30] sm:$0xff]  ;;  %v413_v21 = vld [vmem:[#allocation5 + $0x128] sm:$0xff] }
  0x86   : > { %480 = vmatprep.subr.mxu0 %v379_v29  ;;  %737 = vmatprep.subr.mxu1 %v660_v2  ;;  %v650_v22 = vld [vmem:[#allocation7 + $0x28] sm:$0xff]  ;;  %v412_v23 = vld [vmem:[#allocation5 + $0x120] sm:$0xff]  ;;  %v411_v25 = vld [vmem:[#allocation5 + $0x118] sm:$0xff] }
  0x87   : > { %481 = vmatpush1.msra.mxu0 %v378_v30  ;;  %738 = vmatpush1.msra.mxu1 %v659_v4  ;;  %v649_v24 = vld [vmem:[#allocation7 + $0x20] sm:$0xff]  ;;  %v648_v26 = vld [vmem:[#allocation7 + $0x18] sm:$0xff]  ;;  %v410_v27 = vld [vmem:[#allocation5 + $0x110] sm:$0xff] }
  0x88   : > { %482 = vmatprep.subr.mxu0 %v377_v31  ;;  %739 = vmatprep.subr.mxu1 %v658_v6  ;;  %v647_v28 = vld [vmem:[#allocation7 + $0x10] sm:$0xff]  ;;  %v409_v29 = vld [vmem:[#allocation5 + $0x108] sm:$0xff]  ;;  %v408_v31 = vld [vmem:[#allocation5 + $0x100] sm:$0xff] }
  0x89   : > { %483 = vmatpush1.msra.mxu0 %v376_v32  ;;  %740 = vmatpush1.msra.mxu1 %v657_v8  ;;  %v646_v30 = vld [vmem:[#allocation7 + $0x8] sm:$0xff]  ;;  %v645_v32 = vld [vmem:[#allocation7] sm:$0xff]  ;;  %v707_v36 = vld [vmem:[#allocation7 + $0x1f0] sm:$0xff] }
  0x8a   : > { %484 = vmatprep.subr.mxu0 %v439_v33  ;;  %741 = vmatprep.subr.mxu1 %v656_v10  ;;  %v344_v33 = vld [vmem:[%s1853_s12] sm:$0xff]  ;;  %v706_v37 = vld [vmem:[#allocation7 + $0x1e8] sm:$0xff]  ;;  %v704_v40 = vld [vmem:[#allocation7 + $0x1d8] sm:$0xff] }
  0x8b   : > { %485 = vmatpush2.msra.mxu0 %v438_v34  ;;  %742 = vmatpush1.msra.mxu1 %v655_v12  ;;  %v708_v34 = vld [vmem:[#allocation7 + $0x1f8] sm:$0xff]  ;;  %v705_v38 = vld [vmem:[#allocation7 + $0x1e0] sm:$0xff]  ;;  %v703_v42 = vld [vmem:[#allocation7 + $0x1d0] sm:$0xff] }
  0x8c   : > { %486 = vmatprep.subr.mxu0 %v437_v35  ;;  %743 = vmatprep.subr.mxu1 %v654_v14  ;;  %v347_v35 = vld [vmem:[%s1853_s12 + $0x18] sm:$0xff]  ;;  %v701_v44 = vld [vmem:[#allocation7 + $0x1c0] sm:$0xff]  ;;  %v699_v48 = vld [vmem:[#allocation7 + $0x1b0] sm:$0xff] }
  0x8d   : > { %487 = vmatpush2.msra.mxu0 %v436_v39  ;;  %744 = vmatpush1.msra.mxu1 %v653_v16  ;;  %v346_v39 = vld [vmem:[%s1853_s12 + $0x10] sm:$0xff]  ;;  %v700_v46 = vld [vmem:[#allocation7 + $0x1b8] sm:$0xff]  ;;  %v697_v50 = vld [vmem:[#allocation7 + $0x1a0] sm:$0xff] }
  0x8e   : > { %488 = vmatprep.subr.mxu0 %v435_v41  ;;  %745 = vmatprep.subr.mxu1 %v652_v18  ;;  %v349_v41 = vld [vmem:[%s1853_s12 + $0x28] sm:$0xff]  ;;  %v696_v52 = vld [vmem:[#allocation7 + $0x198] sm:$0xff]  ;;  %v695_v54 = vld [vmem:[#allocation7 + $0x190] sm:$0xff] }
  0x8f   : > { %489 = vmatpush2.msra.mxu0 %v434_v43  ;;  %746 = vmatpush1.msra.mxu1 %v651_v20  ;;  %v702_v43 = vld [vmem:[#allocation7 + $0x1c8] sm:$0xff]  ;;  %v693_v56 = vld [vmem:[#allocation7 + $0x180] sm:$0xff]  ;;  %v692_v58 = vld [vmem:[#allocation7 + $0x178] sm:$0xff] }
  0x90   : > { %490 = vmatprep.subr.mxu0 %v433_v45  ;;  %747 = vmatprep.subr.mxu1 %v650_v22  ;;  %v348_v45 = vld [vmem:[%s1853_s12 + $0x20] sm:$0xff]  ;;  %v691_v60 = vld [vmem:[#allocation7 + $0x170] sm:$0xff]  ;;  %v688_v0 = vld [vmem:[#allocation7 + $0x158] sm:$0xff] }
  0x91   : > { %491 = vmatpush2.msra.mxu0 %v432_v47  ;;  %748 = vmatpush1.msra.mxu1 %v649_v24  ;;  %v351_v47 = vld [vmem:[%s1853_s12 + $0x38] sm:$0xff]  ;;  %v689_v62 = vld [vmem:[#allocation7 + $0x160] sm:$0xff]  ;;  %v687_v2 = vld [vmem:[#allocation7 + $0x150] sm:$0xff] }
  0x92   : > { %492 = vmatprep.subr.mxu0 %v431_v49  ;;  %749 = vmatprep.subr.mxu1 %v648_v26  ;;  %v698_v49 = vld [vmem:[#allocation7 + $0x1a8] sm:$0xff]  ;;  %v685_v4 = vld [vmem:[#allocation7 + $0x140] sm:$0xff]  ;;  %v359_v6 = vld [vmem:[%s1853_s12 + $0x78] sm:$0xff] }
  0x93   : > { %493 = vmatpush2.msra.mxu0 %v430_v51  ;;  %750 = vmatpush1.msra.mxu1 %v647_v28  ;;  %v350_v51 = vld [vmem:[%s1853_s12 + $0x30] sm:$0xff]  ;;  %v361_v8 = vld [vmem:[%s1853_s12 + $0x88] sm:$0xff]  ;;  %v363_v10 = vld [vmem:[%s1853_s12 + $0x98] sm:$0xff] }
  0x94   : > { %494 = vmatprep.subr.mxu0 %v429_v53  ;;  %751 = vmatprep.subr.mxu1 %v646_v30  ;;  %v353_v53 = vld [vmem:[%s1853_s12 + $0x48] sm:$0xff]  ;;  %v367_v14 = vld [vmem:[%s1853_s12 + $0xb8] sm:$0xff] }
  0x95   : > { %495 = vmatpush2.msra.mxu0 %v428_v55  ;;  %752 = vmatpush1.msra.mxu1 %v645_v32  ;;  %v694_v55 = vld [vmem:[#allocation7 + $0x188] sm:$0xff]  ;;  %v371_v18 = vld [vmem:[%s1853_s12 + $0xd8] sm:$0xff] }
  0x96   : > { %496 = vmatprep.subr.mxu0 %v427_v57  ;;  %753 = vmatprep.subr.mxu1 %v708_v34  ;;  %v352_v57 = vld [vmem:[%s1853_s12 + $0x40] sm:$0xff]  ;;  %v365_v12 = vld [vmem:[%s1853_s12 + $0xa8] sm:$0xff]  ;;  %v375_v22 = vld [vmem:[%s1853_s12 + $0xf8] sm:$0xff] }
  0x97   : > { %497 = vmatpush2.msra.mxu0 %v426_v59  ;;  %754 = vmatpush2.msra.mxu1 %v707_v36  ;;  %v355_v59 = vld [vmem:[%s1853_s12 + $0x58] sm:$0xff]  ;;  %v369_v16 = vld [vmem:[%s1853_s12 + $0xc8] sm:$0xff] }
  0x98   : > { %498 = vmatprep.subr.mxu0 %v425_v61  ;;  %755 = vmatprep.subr.mxu1 %v706_v37  ;;  %v690_v61 = vld [vmem:[#allocation7 + $0x168] sm:$0xff]  ;;  %v684_v24 = vld [vmem:[#allocation7 + $0x138] sm:$0xff]  ;;  %v1909_v37 = vld [vmem:[#allocation8 + $0xd0] sm:$0xff] }
  0x99   : > { %499 = vmatpush2.msra.mxu0 %v424_v63  ;;  %756 = vmatpush2.msra.mxu1 %v705_v38  ;;  %v354_v63 = vld [vmem:[%s1853_s12 + $0x50] sm:$0xff]  ;;  %v373_v20 = vld [vmem:[%s1853_s12 + $0xe8] sm:$0xff]  ;;  %v680_v28 = vld [vmem:[#allocation7 + $0x118] sm:$0xff] }
  0x9a   : > { %500 = vmatprep.subr.mxu0 %v423_v1  ;;  %757 = vmatprep.subr.mxu1 %v704_v40  ;;  %v357_v1 = vld [vmem:[%s1853_s12 + $0x68] sm:$0xff]  ;;  %v945_v32 = vld [vmem:[#allocation8 + $0xf8] sm:$0xff] }
  0x9b   : > { %501 = vmatpush2.msra.mxu0 %v422_v3  ;;  %758 = vmatpush2.msra.mxu1 %v703_v42  ;;  %v686_v3 = vld [vmem:[#allocation7 + $0x148] sm:$0xff]  ;;  %v1906_v36 = vld [vmem:[#allocation8 + $0xd8] sm:$0xff] }
  0x9c   : > { %502 = vmatprep.subr.mxu0 %v421_v5  ;;  %759 = vmatprep.subr.mxu1 %v702_v43  ;;  %v356_v5 = vld [vmem:[%s1853_s12 + $0x60] sm:$0xff]  ;;  %v682_v26 = vld [vmem:[#allocation7 + $0x128] sm:$0xff]  ;;  %v1918_v40 = vld [vmem:[#allocation8 + $0xb8] sm:$0xff] }
  0x9d   : > { %503 = vmatpush2.msra.mxu0 %v420_v7  ;;  %760 = vmatpush2.msra.mxu1 %v701_v44  ;;  %v358_v7 = vld [vmem:[%s1853_s12 + $0x70] sm:$0xff]  ;;  %v678_v30 = vld [vmem:[#allocation7 + $0x108] sm:$0xff]  ;;  %v1927_v43 = vld [vmem:[#allocation8 + $0xa0] sm:$0xff] }
  0x9e   : > { %504 = vmatprep.subr.mxu0 %v419_v9  ;;  %761 = vmatprep.subr.mxu1 %v700_v46  ;;  %v360_v9 = vld [vmem:[%s1853_s12 + $0x80] sm:$0xff]  ;;  %v1901_v34 = vld [vmem:[#allocation8 + $0xe8] sm:$0xff]  ;;  %v1930_v44 = vld [vmem:[#allocation8 + $0x98] sm:$0xff] }
  0x9f   : > { %505 = vmatpush2.msra.mxu0 %v418_v11  ;;  %762 = vmatpush2.msra.mxu1 %v699_v48  ;;  %v362_v11 = vld [vmem:[%s1853_s12 + $0x90] sm:$0xff]  ;;  %v1912_v38 = vld [vmem:[#allocation8 + $0xc8] sm:$0xff]  ;;  %v1942_v48 = vld [vmem:[#allocation8 + $0x78] sm:$0xff] }
  0xa0   : > { %506 = vmatprep.subr.mxu0 %v417_v13  ;;  %763 = vmatprep.subr.mxu1 %v698_v49  ;;  %v364_v13 = vld [vmem:[%s1853_s12 + $0xa0] sm:$0xff]  ;;  %v1924_v42 = vld [vmem:[#allocation8 + $0xa8] sm:$0xff]  ;;  %v1945_v49 = vld [vmem:[#allocation8 + $0x70] sm:$0xff] }
  0xa1   : > { %507 = vmatpush2.msra.mxu0 %v416_v15  ;;  %764 = vmatpush2.msra.mxu1 %v697_v50  ;;  %v366_v15 = vld [vmem:[%s1853_s12 + $0xb0] sm:$0xff]  ;;  %v1936_v46 = vld [vmem:[#allocation8 + $0x88] sm:$0xff] }
  0xa2   : > { %508 = vmatprep.subr.mxu0 %v415_v17  ;;  %765 = vmatprep.subr.mxu1 %v696_v52  ;;  %v368_v17 = vld [vmem:[%s1853_s12 + $0xc0] sm:$0xff]  ;;  %v1948_v50 = vld [vmem:[#allocation8 + $0x68] sm:$0xff]  ;;  %v1954_v52 = vld [vmem:[#allocation8 + $0x58] sm:$0xff] }
  0xa3   : > { %509 = vmatpush2.msra.mxu0 %v414_v19  ;;  %766 = vmatpush2.msra.mxu1 %v695_v54  ;;  %v370_v19 = vld [vmem:[%s1853_s12 + $0xd0] sm:$0xff]  ;;  %v1960_v54 = vld [vmem:[#allocation8 + $0x48] sm:$0xff] }
  0xa4   : > { %510 = vmatprep.subr.mxu0 %v413_v21  ;;  %767 = vmatprep.subr.mxu1 %v694_v55  ;;  %v372_v21 = vld [vmem:[%s1853_s12 + $0xe0] sm:$0xff] }
  0xa5   : > { %511 = vmatpush2.msra.mxu0 %v412_v23  ;;  %768 = vmatpush2.msra.mxu1 %v693_v56  ;;  %v374_v23 = vld [vmem:[%s1853_s12 + $0xf0] sm:$0xff]  ;;  %v1963_v55 = vld [vmem:[#allocation8 + $0x40] sm:$0xff]  ;;  %v1966_v56 = vld [vmem:[#allocation8 + $0x38] sm:$0xff]  ;;  %s1657_s12 = smov [#allocation10]  }
  0xa6   : > { %512 = vmatprep.subr.mxu0 %v411_v25  ;;  %769 = vmatprep.subr.mxu1 %v692_v58  ;;  %v683_v25 = vld [vmem:[#allocation7 + $0x130] sm:$0xff]  ;;  %v1972_v58 = vld [vmem:[#allocation8 + $0x28] sm:$0xff]  ;;  %s1581_s30 = sshll.u32 %s1657_s12, 4  ;;  %s1582_s30 = int_to_ptr.vmem [resolvable:$false] %s1581_s30 }
  0xa7   : > { %513 = vmatpush2.msra.mxu0 %v410_v27  ;;  %770 = vmatpush2.msra.mxu1 %v691_v60  ;;  %v681_v27 = vld [vmem:[#allocation7 + $0x120] sm:$0xff]  ;;  %v1978_v60 = vld [vmem:[#allocation8 + $0x18] sm:$0xff]  ;;  %s1583_s9 = scalar_lea.vmem %s1582_s30, 8192  ;;  %p1584_p13 = scmp.lt.s32.totalorder %s2286_s22, %s1582_s30 }
  0xa8   : > { %514 = vmatprep.subr.mxu0 %v409_v29  ;;  %771 = vmatprep.subr.mxu1 %v690_v61  ;;  %v679_v29 = vld [vmem:[#allocation7 + $0x110] sm:$0xff]  ;;  %p1585_p0 = scmp.lt.s32.totalorder %s1583_s9, %s1577_s16 }
  0xa9   : > { %515 = vmatpush2.msra.mxu0 %v408_v31  ;;  %772 = vmatpush2.msra.mxu1 %v689_v62  ;;  %v677_v31 = vld [vmem:[#allocation7 + $0x100] sm:$0xff]  ;;  %v1981_v61 = vld [vmem:[#allocation8 + $0x10] sm:$0xff]  ;;  %v1984_v62 = vld [vmem:[#allocation8 + $0x8] sm:$0xff] }
  0xaa   : > { %517 = vmatmul.mubr.f32.vlgmr.msra.gmra.mxu0 %v344_v33  ;;  %773 = vmatprep.subr.mxu1 %v688_v0  ;;  %v1899_v33 = vld [vmem:[#allocation8 + $0xf0] sm:$0xff]  ;;  %v1990_v0 = vld [vmem:[#allocation8 + $0x1f8] sm:$0xff]  ;;  %p1586_p2 = por %p1585_p0, %p1584_p13 }
  0xab   : > { %522 = vmatprep.mubr.f32.mxu0 %v347_v35  ;;  %774 = vmatpush2.msra.mxu1 %v687_v2  ;;  %v1903_v35 = vld [vmem:[#allocation8 + $0xe0] sm:$0xff]  ;;  %v1996_v2 = vld [vmem:[#allocation8 + $0x1e8] sm:$0xff] }
  0xac   : > { %775 = vmatprep.subr.mxu1 %v686_v3  ;;  %990 = vmatprep.subr.mxu0 %v945_v32  ;;  %v1999_v3 = vld [vmem:[#allocation8 + $0x1e0] sm:$0xff]  ;;  %p1587_p10 = pnand %p1586_p2, %p1580_p9 }
  0xad   : > { %776 = vmatpush2.msra.mxu1 %v685_v4  ;;  %991 = vmatpush1.msra.mxu0 %v1899_v33  ;;  %v2002_v4 = vld [vmem:[#allocation8 + $0x1d8] sm:$0xff] }
  0xae   : > { %523 = vmatmul.mubr.f32.gmra.mxu0 %v346_v39  ;;  %777 = vmatprep.subr.mxu1 %v684_v24  ;;  %v1915_v39 = vld [vmem:[#allocation8 + $0xc0] sm:$0xff]  ;;  %v2056_v24 = vld [vmem:[#allocation8 + $0x148] sm:$0xff] }
  0xaf   : > { %528 = vmatprep.mubr.f32.mxu0 %v349_v41  ;;  %778 = vmatpush2.msra.mxu1 %v683_v25  ;;  %v1921_v41 = vld [vmem:[#allocation8 + $0xb0] sm:$0xff]  ;;  %2378 = vst [vmem:[#allocation20_spill] sm:$0xff] %v2056_v24  ;;  %v2059_v25 = vld [vmem:[#allocation8 + $0x140] sm:$0xff] }
  0xb0   : > { %779 = vmatprep.subr.mxu1 %v682_v26  ;;  %992 = vmatprep.subr.mxu0 %v1901_v34  ;;  %2379 = vst [vmem:[#allocation21_spill] sm:$0xff] %v2059_v25 }
  0xb1   : > { %780 = vmatpush2.msra.mxu1 %v681_v27  ;;  %993 = vmatpush1.msra.mxu0 %v1903_v35  ;;  %v440_v27 = vld [vmem:[%s2334_s2] sm:$0x3] }
  0xb2   : > { %529 = vmatmul.mubr.f32.gmra.mxu0 %v348_v45  ;;  %781 = vmatprep.subr.mxu1 %v680_v28  ;;  %v1933_v45 = vld [vmem:[#allocation8 + $0x90] sm:$0xff] }
  0xb3   : > { %534 = vmatprep.mubr.f32.mxu0 %v351_v47  ;;  %782 = vmatpush2.msra.mxu1 %v679_v29  ;;  %v1939_v47 = vld [vmem:[#allocation8 + $0x80] sm:$0xff] }
  0xb4   : > { %783 = vmatprep.subr.mxu1 %v678_v30  ;;  %994 = vmatprep.subr.mxu0 %v1906_v36 }
  0xb5   : > { %784 = vmatpush2.msra.mxu1 %v677_v31  ;;  %995 = vmatpush1.msra.mxu0 %v1909_v37 }
  0xb6   : > { %535 = vmatmul.mubr.f32.gmra.mxu0 %v350_v51  ;;  %1326 = vmatprep.subr.mxu1 %v945_v32  ;;  %v1951_v51 = vld [vmem:[#allocation8 + $0x60] sm:$0xff] }
  0xb7   : > { %540 = vmatprep.mubr.f32.mxu0 %v353_v53  ;;  %996 = vmatprep.subr.mxu0 %v1912_v38  ;;  %v1957_v53 = vld [vmem:[#allocation8 + $0x50] sm:$0xff] }
  0xb8   : > { %997 = vmatpush1.msra.mxu0 %v1915_v39 }
  0xb9   : > { %998 = vmatprep.subr.mxu0 %v1918_v40 }
  0xba   : > { %541 = vmatmul.mubr.f32.gmra.mxu0 %v352_v57  ;;  %v1969_v57 = vld [vmem:[#allocation8 + $0x30] sm:$0xff] }
  0xbb   : > { %546 = vmatprep.mubr.f32.mxu0 %v355_v59  ;;  %999 = vmatpush1.msra.mxu0 %v1921_v41  ;;  %v1975_v59 = vld [vmem:[#allocation8 + $0x20] sm:$0xff] }
  0xbc   : > { %1000 = vmatprep.subr.mxu0 %v1924_v42 }
  0xbd   : > { %1001 = vmatpush1.msra.mxu0 %v1927_v43 }
  0xbe   : > { %547 = vmatmul.mubr.f32.gmra.mxu0 %v354_v63  ;;  %1002 = vmatprep.subr.mxu0 %v1930_v44  ;;  %v1987_v63 = vld [vmem:[#allocation8] sm:$0xff] }
  0xbf   : > { %552 = vmatprep.mubr.f32.mxu0 %v357_v1  ;;  %1003 = vmatpush1.msra.mxu0 %v1933_v45  ;;  %v1993_v1 = vld [vmem:[#allocation8 + $0x1f0] sm:$0xff] }
  0xc0   : > { %1004 = vmatprep.subr.mxu0 %v1936_v46 }
  0xc1   : > { %1005 = vmatpush1.msra.mxu0 %v1939_v47 }
  0xc2   : > { %553 = vmatmul.mubr.f32.gmra.mxu0 %v356_v5  ;;  %1006 = vmatprep.subr.mxu0 %v1942_v48  ;;  %v2005_v5 = vld [vmem:[#allocation8 + $0x1d0] sm:$0xff] }
  0xc3   : > { %558 = vmatprep.mubr.f32.mxu0 %v359_v6  ;;  %1007 = vmatpush1.msra.mxu0 %v1945_v49  ;;  %v2008_v6 = vld [vmem:[#allocation8 + $0x1c8] sm:$0xff] }
  0xc4   : > { %1008 = vmatprep.subr.mxu0 %v1948_v50 }
  0xc5   : > { %1009 = vmatpush1.msra.mxu0 %v1951_v51 }
  0xc6   : > { %559 = vmatmul.mubr.f32.gmra.mxu0 %v358_v7  ;;  %1010 = vmatprep.subr.mxu0 %v1954_v52  ;;  %v2011_v7 = vld [vmem:[#allocation8 + $0x1c0] sm:$0xff] }
  0xc7   : > { %564 = vmatprep.mubr.f32.mxu0 %v361_v8  ;;  %1011 = vmatpush1.msra.mxu0 %v1957_v53  ;;  %v2014_v8 = vld [vmem:[#allocation8 + $0x1b8] sm:$0xff] }
  0xc8   : > { %1012 = vmatprep.subr.mxu0 %v1960_v54 }
  0xc9   : > { %1013 = vmatpush1.msra.mxu0 %v1963_v55 }
  0xca   : > { %565 = vmatmul.mubr.f32.gmra.mxu0 %v360_v9  ;;  %1014 = vmatprep.subr.mxu0 %v1966_v56  ;;  %v2017_v9 = vld [vmem:[#allocation8 + $0x1b0] sm:$0xff] }
  0xcb   : > { %570 = vmatprep.mubr.f32.mxu0 %v363_v10  ;;  %1015 = vmatpush1.msra.mxu0 %v1969_v57  ;;  %v2020_v10 = vld [vmem:[#allocation8 + $0x1a8] sm:$0xff] }
  0xcc   : > { %1016 = vmatprep.subr.mxu0 %v1972_v58 }
  0xcd   : > { %1017 = vmatpush1.msra.mxu0 %v1975_v59 }
  0xce   : > { %571 = vmatmul.mubr.f32.gmra.mxu0 %v362_v11  ;;  %1018 = vmatprep.subr.mxu0 %v1978_v60  ;;  %v2023_v11 = vld [vmem:[#allocation8 + $0x1a0] sm:$0xff] }
  0xcf   : > { %576 = vmatprep.mubr.f32.mxu0 %v365_v12  ;;  %1019 = vmatpush1.msra.mxu0 %v1981_v61  ;;  %v2026_v12 = vld [vmem:[#allocation8 + $0x198] sm:$0xff] }
  0xd0   : > { %1020 = vmatprep.subr.mxu0 %v1984_v62 }
  0xd1   : > { %1021 = vmatpush1.msra.mxu0 %v1987_v63 }
  0xd2   : > { %577 = vmatmul.mubr.f32.gmra.mxu0 %v364_v13  ;;  %1022 = vmatprep.subr.mxu0 %v1990_v0  ;;  %v2029_v13 = vld [vmem:[#allocation8 + $0x190] sm:$0xff] }
  0xd3   : > { %582 = vmatprep.mubr.f32.mxu0 %v367_v14  ;;  %1023 = vmatpush2.msra.mxu0 %v1993_v1  ;;  %v2032_v14 = vld [vmem:[#allocation8 + $0x188] sm:$0xff] }
  0xd4   : > { %1024 = vmatprep.subr.mxu0 %v1996_v2 }
  0xd5   : > { %1025 = vmatpush2.msra.mxu0 %v1999_v3 }
  0xd6   : > { %583 = vmatmul.mubr.f32.gmra.mxu0 %v366_v15  ;;  %1026 = vmatprep.subr.mxu0 %v2002_v4  ;;  %v2035_v15 = vld [vmem:[#allocation8 + $0x180] sm:$0xff] }
  0xd7   : > { %588 = vmatprep.mubr.f32.mxu0 %v369_v16  ;;  %1027 = vmatpush2.msra.mxu0 %v2005_v5  ;;  %v442_v16 = vlaneseq }
  0xd8   : > { %1028 = vmatprep.subr.mxu0 %v2008_v6 }
  0xd9   : > { %1029 = vmatpush2.msra.mxu0 %v2011_v7 }
  0xda   : > { %589 = vmatmul.mubr.f32.gmra.mxu0 %v368_v17  ;;  %1030 = vmatprep.subr.mxu0 %v2014_v8  ;;  %v2038_v17 = vld [vmem:[#allocation8 + $0x178] sm:$0xff] }
  0xdb   : > { %594 = vmatprep.mubr.f32.mxu0 %v371_v18  ;;  %1031 = vmatpush2.msra.mxu0 %v2017_v9  ;;  %v2041_v18 = vld [vmem:[#allocation8 + $0x170] sm:$0xff] }
  0xdc   : > { %1032 = vmatprep.subr.mxu0 %v2020_v10  ;;  %2373 = vst [vmem:[#allocation15_spill] sm:$0xff] %v2041_v18 }
  0xdd   : > { %1033 = vmatpush2.msra.mxu0 %v2023_v11 }
  0xde   : > { %595 = vmatmul.mubr.f32.gmra.mxu0 %v370_v19  ;;  %1034 = vmatprep.subr.mxu0 %v2026_v12  ;;  %v2044_v19 = vld [vmem:[#allocation8 + $0x168] sm:$0xff] }
  0xdf   : > { %600 = vmatprep.mubr.f32.mxu0 %v373_v20  ;;  %1035 = vmatpush2.msra.mxu0 %v2029_v13  ;;  %2374 = vst [vmem:[#allocation16_spill] sm:$0xff] %v2044_v19  ;;  %v2047_v20 = vld [vmem:[#allocation8 + $0x160] sm:$0xff] }
  0xe0   : > { %1036 = vmatprep.subr.mxu0 %v2032_v14  ;;  %2375 = vst [vmem:[#allocation17_spill] sm:$0xff] %v2047_v20 }
  0xe1   : > { %1037 = vmatpush2.msra.mxu0 %v2035_v15 }
  0xe2   : > { %601 = vmatmul.mubr.f32.gmra.mxu0 %v372_v21  ;;  %1038 = vmatprep.subr.mxu0 %v2038_v17  ;;  %v443_v21 = vshrl.u32 %v442_v16, 7 }
  0xe3   : > { %606 = vmatprep.mubr.f32.mxu0 %v375_v22  ;;  %1039 = vmatpush2.msra.mxu0 %v2041_v18  ;;  %v2050_v22 = vld [vmem:[#allocation8 + $0x158] sm:$0xff] }
  0xe4   : > { %2376 = vst [vmem:[#allocation18_spill] sm:$0xff] %v2050_v22  ;;  %1040 = vmatprep.subr.mxu0 %v2044_v19  ;;  %v2061_v26 = vsub.s32 0, %v443_v21  ;;  %v2067_v28 = vsub.s32 1, %v443_v21 }
  0xe5   : > { %1041 = vmatpush2.msra.mxu0 %v2047_v20 }
  0xe6   : > { %607 = vmatmul.mubr.f32.gmra.mxu0 %v374_v23  ;;  %v2053_v23 = vld [vmem:[#allocation8 + $0x150] sm:$0xff]  ;;  %1042 = vmatprep.subr.mxu0 %v2050_v22  ;;  %2380 = vst [vmem:[#allocation22_spill] sm:$0xff] %v2061_v26  ;;  %2381 = vst [vmem:[#allocation23_spill] sm:$0xff] %v2067_v28  ;;  %v2072_v29 = vrot.slane %v440_v27, %v2061_v26  ;;  %v2075_v30 = vrot.slane %v440_v27, %v2067_v28 }
  0xe7   : > { %2377 = vst [vmem:[#allocation19_spill] sm:$0xff] %v2053_v23  ;;  %1043 = vmatpush2.msra.mxu0 %v2053_v23 }
  0xe8   : > { %1044 = vmatprep.subr.mxu0 %v2056_v24 }
  0xe9   : > { %1045 = vmatpush2.msra.mxu0 %v2059_v25 }
 0x16a   : > { %v518_v31 = vpop.f32.mrf.mxu0 }
 0x16b   : > { %v519_v32 = vadd.f32 %v518_v31, %v2072_v29 }
 0x16c   : > { %v520_v16 = vpop.f32.mrf.mxu0 }
 0x16d   : > { %v521_v23 = vadd.f32 %v520_v16, %v2075_v30  ;;  %v613_v21 = vmax.f32 %v519_v32, 0.0 }
 0x16e   : > { %v524_v22 = vpop.f32.mrf.mxu0 }
 0x16f   : > { %v614_v20 = vmax.f32 %v521_v23, 0.0  ;;  %v525_v19 = vadd.f32 %v524_v22, %v2072_v29 }
 0x170   : > { %v526_v24 = vpop.f32.mrf.mxu0 }
 0x171   : > { %v527_v25 = vadd.f32 %v526_v24, %v2075_v30  ;;  %785 = vmatprep.mubr.f32.mxu1 %v614_v20  ;;  %v615_v27 = vmax.f32 %v525_v19, 0.0 }
 0x172   : > { %v530_v26 = vpop.f32.mrf.mxu0  ;;  %786 = vmatmul.mubr.f32.vlgmr.msra.gmra.mxu1 %v613_v21 }
 0x173   : > { %v616_v18 = vmax.f32 %v527_v25, 0.0  ;;  %1358 = vmatpush1.msra.mxu1 %v1899_v33  ;;  %v531_v31 = vadd.f32 %v530_v26, %v2072_v29 }
 0x174   : > { %v532_v28 = vpop.f32.mrf.mxu0  ;;  %1327 = vmatprep.subr.mxu1 %v1901_v34 }
 0x175   : > { %v533_v23 = vadd.f32 %v532_v28, %v2075_v30  ;;  %791 = vmatprep.mubr.f32.mxu1 %v616_v18  ;;  %1359 = vmatpush1.msra.mxu1 %v1903_v35  ;;  %v617_v24 = vmax.f32 %v531_v31, 0.0 }
 0x176   : > { %v536_v22 = vpop.f32.mrf.mxu0  ;;  %792 = vmatmul.mubr.f32.gmra.mxu1 %v615_v27  ;;  %1328 = vmatprep.subr.mxu1 %v1906_v36 }
 0x177   : > { %v618_v20 = vmax.f32 %v533_v23, 0.0  ;;  %1360 = vmatpush1.msra.mxu1 %v1909_v37  ;;  %v537_v33 = vadd.f32 %v536_v22, %v2072_v29 }
 0x178   : > { %v538_v19 = vpop.f32.mrf.mxu0  ;;  %1329 = vmatprep.subr.mxu1 %v1912_v38 }
 0x179   : > { %v539_v34 = vadd.f32 %v538_v19, %v2075_v30  ;;  %797 = vmatprep.mubr.f32.mxu1 %v618_v20  ;;  %1361 = vmatpush1.msra.mxu1 %v1915_v39  ;;  %v619_v36 = vmax.f32 %v537_v33, 0.0 }
 0x17a   : > { %v542_v18 = vpop.f32.mrf.mxu0  ;;  %798 = vmatmul.mubr.f32.gmra.mxu1 %v617_v24  ;;  %1330 = vmatprep.subr.mxu1 %v1918_v40 }
 0x17b   : > { %v620_v35 = vmax.f32 %v539_v34, 0.0  ;;  %1362 = vmatpush1.msra.mxu1 %v1921_v41  ;;  %v543_v37 = vadd.f32 %v542_v18, %v2072_v29 }
 0x17c   : > { %v544_v25 = vpop.f32.mrf.mxu0  ;;  %1331 = vmatprep.subr.mxu1 %v1924_v42 }
 0x17d   : > { %v545_v38 = vadd.f32 %v544_v25, %v2075_v30  ;;  %803 = vmatprep.mubr.f32.mxu1 %v620_v35  ;;  %1363 = vmatpush1.msra.mxu1 %v1927_v43  ;;  %v621_v40 = vmax.f32 %v543_v37, 0.0 }
 0x17e   : > { %v548_v26 = vpop.f32.mrf.mxu0  ;;  %804 = vmatmul.mubr.f32.gmra.mxu1 %v619_v36  ;;  %1332 = vmatprep.subr.mxu1 %v1930_v44 }
 0x17f   : > { %v622_v39 = vmax.f32 %v545_v38, 0.0  ;;  %1364 = vmatpush1.msra.mxu1 %v1933_v45  ;;  %v549_v41 = vadd.f32 %v548_v26, %v2072_v29 }
 0x180   : > { %v550_v28 = vpop.f32.mrf.mxu0  ;;  %1333 = vmatprep.subr.mxu1 %v1936_v46 }
 0x181   : > { %v551_v42 = vadd.f32 %v550_v28, %v2075_v30  ;;  %809 = vmatprep.mubr.f32.mxu1 %v622_v39  ;;  %1365 = vmatpush1.msra.mxu1 %v1939_v47  ;;  %v623_v44 = vmax.f32 %v549_v41, 0.0  ;;  %v2383_v39 = vld [vmem:[#allocation16_spill] sm:$0xff] }
 0x182   : > { %v554_v32 = vpop.f32.mrf.mxu0  ;;  %810 = vmatmul.mubr.f32.gmra.mxu1 %v621_v40  ;;  %1334 = vmatprep.subr.mxu1 %v1942_v48  ;;  %v2384_v40 = vld [vmem:[#allocation17_spill] sm:$0xff] }
 0x183   : > { %v624_v43 = vmax.f32 %v551_v42, 0.0  ;;  %1366 = vmatpush1.msra.mxu1 %v1945_v49  ;;  %v555_v45 = vadd.f32 %v554_v32, %v2072_v29 }
 0x184   : > { %v556_v16 = vpop.f32.mrf.mxu0  ;;  %1335 = vmatprep.subr.mxu1 %v1948_v50 }
 0x185   : > { %v557_v46 = vadd.f32 %v556_v16, %v2075_v30  ;;  %815 = vmatprep.mubr.f32.mxu1 %v624_v43  ;;  %1367 = vmatpush1.msra.mxu1 %v1951_v51  ;;  %v625_v48 = vmax.f32 %v555_v45, 0.0  ;;  %v2388_v16 = vld [vmem:[#allocation21_spill] sm:$0xff] }
 0x186   : > { %v560_v21 = vpop.f32.mrf.mxu0  ;;  %816 = vmatmul.mubr.f32.gmra.mxu1 %v623_v44  ;;  %1336 = vmatprep.subr.mxu1 %v1954_v52  ;;  %v2387_v44 = vld [vmem:[#allocation20_spill] sm:$0xff] }
 0x187   : > { %v626_v47 = vmax.f32 %v557_v46, 0.0  ;;  %1368 = vmatpush1.msra.mxu1 %v1957_v53  ;;  %v561_v49 = vadd.f32 %v560_v21, %v2072_v29 }
 0x188   : > { %v562_v27 = vpop.f32.mrf.mxu0  ;;  %1337 = vmatprep.subr.mxu1 %v1960_v54 }
 0x189   : > { %v563_v50 = vadd.f32 %v562_v27, %v2075_v30  ;;  %821 = vmatprep.mubr.f32.mxu1 %v626_v47  ;;  %1369 = vmatpush1.msra.mxu1 %v1963_v55  ;;  %v627_v52 = vmax.f32 %v561_v49, 0.0  ;;  %v953_v47 = vld [vmem:[#allocation8 + $0x138] sm:$0xff]  ;;  %v951_v49 = vld [vmem:[#allocation8 + $0x128] sm:$0xff]  ;;  %v948_v27 = vld [vmem:[#allocation8 + $0x110] sm:$0xff] }
 0x18a   : > { %v566_v31 = vpop.f32.mrf.mxu0  ;;  %822 = vmatmul.mubr.f32.gmra.mxu1 %v625_v48  ;;  %1338 = vmatprep.subr.mxu1 %v1966_v56  ;;  %v952_v48 = vld [vmem:[#allocation8 + $0x130] sm:$0xff] }
 0x18b   : > { %v628_v51 = vmax.f32 %v563_v50, 0.0  ;;  %1370 = vmatpush1.msra.mxu1 %v1969_v57  ;;  %v567_v53 = vadd.f32 %v566_v31, %v2072_v29  ;;  %1046 = vmatprep.subr.mxu0 %v953_v47  ;;  %v947_v50 = vld [vmem:[#allocation8 + $0x108] sm:$0xff]  ;;  %v946_v31 = vld [vmem:[#allocation8 + $0x100] sm:$0xff] }
 0x18c   : > { %v568_v23 = vpop.f32.mrf.mxu0  ;;  %1339 = vmatprep.subr.mxu1 %v1972_v58  ;;  %1047 = vmatpush2.msra.mxu0 %v952_v48 }
 0x18d   : > { %v569_v54 = vadd.f32 %v568_v23, %v2075_v30  ;;  %827 = vmatprep.mubr.f32.mxu1 %v628_v51  ;;  %1371 = vmatpush1.msra.mxu1 %v1975_v59  ;;  %v629_v56 = vmax.f32 %v567_v53, 0.0  ;;  %v709_v51 = vld [vmem:[%s2336_s4] sm:$0x3] }
 0x18e   : > { %v572_v22 = vpop.f32.mrf.mxu0  ;;  %828 = vmatmul.mubr.f32.gmra.mxu1 %v627_v52  ;;  %1340 = vmatprep.subr.mxu1 %v1978_v60  ;;  %v2389_v52 = vld [vmem:[#allocation22_spill] sm:$0xff]  ;;  %v2390_v23 = vld [vmem:[#allocation23_spill] sm:$0xff] }
 0x18f   : > { %v630_v55 = vmax.f32 %v569_v54, 0.0  ;;  %1372 = vmatpush1.msra.mxu1 %v1981_v61  ;;  %v573_v57 = vadd.f32 %v572_v22, %v2072_v29  ;;  %1048 = vmatprep.subr.mxu0 %v951_v49  ;;  %v2168_v53 = vrot.slane %v709_v51, %v2389_v52  ;;  %v2171_v54 = vrot.slane %v709_v51, %v2390_v23 }
 0x190   : > { %v574_v20 = vpop.f32.mrf.mxu0  ;;  %1341 = vmatprep.subr.mxu1 %v1984_v62 }
 0x191   : > { %v575_v58 = vadd.f32 %v574_v20, %v2075_v30  ;;  %833 = vmatprep.mubr.f32.mxu1 %v630_v55  ;;  %1373 = vmatpush1.msra.mxu1 %v1987_v63  ;;  %v631_v60 = vmax.f32 %v573_v57, 0.0 }
 0x192   : > { %v578_v24 = vpop.f32.mrf.mxu0  ;;  %834 = vmatmul.mubr.f32.gmra.mxu1 %v629_v56  ;;  %1342 = vmatprep.subr.mxu1 %v1990_v0 }
 0x193   : > { %v632_v59 = vmax.f32 %v575_v58, 0.0  ;;  %1374 = vmatpush2.msra.mxu1 %v1993_v1  ;;  %v579_v61 = vadd.f32 %v578_v24, %v2072_v29 }
 0x194   : > { %v580_v33 = vpop.f32.mrf.mxu0  ;;  %1343 = vmatprep.subr.mxu1 %v1996_v2 }
 0x195   : > { %v581_v62 = vadd.f32 %v580_v33, %v2075_v30  ;;  %839 = vmatprep.mubr.f32.mxu1 %v632_v59  ;;  %1375 = vmatpush2.msra.mxu1 %v1999_v3  ;;  %v633_v0 = vmax.f32 %v579_v61, 0.0 }
 0x196   : > { %v584_v19 = vpop.f32.mrf.mxu0  ;;  %840 = vmatmul.mubr.f32.gmra.mxu1 %v631_v60  ;;  %1344 = vmatprep.subr.mxu1 %v2002_v4 }
 0x197   : > { %v634_v63 = vmax.f32 %v581_v62, 0.0  ;;  %1376 = vmatpush2.msra.mxu1 %v2005_v5  ;;  %v585_v1 = vadd.f32 %v584_v19, %v2072_v29 }
 0x198   : > { %v586_v34 = vpop.f32.mrf.mxu0  ;;  %1345 = vmatprep.subr.mxu1 %v2008_v6 }
 0x199   : > { %v587_v2 = vadd.f32 %v586_v34, %v2075_v30  ;;  %845 = vmatprep.mubr.f32.mxu1 %v634_v63  ;;  %1377 = vmatpush2.msra.mxu1 %v2011_v7  ;;  %v635_v4 = vmax.f32 %v585_v1, 0.0 }
 0x19a   : > { %v590_v18 = vpop.f32.mrf.mxu0  ;;  %846 = vmatmul.mubr.f32.gmra.mxu1 %v633_v0  ;;  %1346 = vmatprep.subr.mxu1 %v2014_v8 }
 0x19b   : > { %v636_v3 = vmax.f32 %v587_v2, 0.0  ;;  %1378 = vmatpush2.msra.mxu1 %v2017_v9  ;;  %v591_v5 = vadd.f32 %v590_v18, %v2072_v29 }
 0x19c   : > { %v592_v35 = vpop.f32.mrf.mxu0  ;;  %1347 = vmatprep.subr.mxu1 %v2020_v10 }
 0x19d   : > { %v593_v6 = vadd.f32 %v592_v35, %v2075_v30  ;;  %851 = vmatprep.mubr.f32.mxu1 %v636_v3  ;;  %1379 = vmatpush2.msra.mxu1 %v2023_v11  ;;  %v637_v8 = vmax.f32 %v591_v5, 0.0 }
 0x19e   : > { %v596_v36 = vpop.f32.mrf.mxu0  ;;  %852 = vmatmul.mubr.f32.gmra.mxu1 %v635_v4  ;;  %1348 = vmatprep.subr.mxu1 %v2026_v12  ;;  %v2382_v12 = vld [vmem:[#allocation15_spill] sm:$0xff] }
 0x19f   : > { %v638_v7 = vmax.f32 %v593_v6, 0.0  ;;  %1380 = vmatpush2.msra.mxu1 %v2029_v13  ;;  %v597_v9 = vadd.f32 %v596_v36, %v2072_v29 }
 0x1a0   : > { %v598_v37 = vpop.f32.mrf.mxu0  ;;  %1349 = vmatprep.subr.mxu1 %v2032_v14 }
 0x1a1   : > { %v599_v10 = vadd.f32 %v598_v37, %v2075_v30  ;;  %857 = vmatprep.mubr.f32.mxu1 %v638_v7  ;;  %1381 = vmatpush2.msra.mxu1 %v2035_v15  ;;  %v639_v38 = vmax.f32 %v597_v9, 0.0  ;;  %v2385_v15 = vld [vmem:[#allocation18_spill] sm:$0xff] }
 0x1a2   : > { %v602_v25 = vpop.f32.mrf.mxu0  ;;  %858 = vmatmul.mubr.f32.gmra.mxu1 %v637_v8  ;;  %1350 = vmatprep.subr.mxu1 %v2038_v17  ;;  %v2386_v17 = vld [vmem:[#allocation19_spill] sm:$0xff] }
 0x1a3   : > { %v640_v11 = vmax.f32 %v599_v10, 0.0  ;;  %1382 = vmatpush2.msra.mxu1 %v2382_v12  ;;  %v603_v13 = vadd.f32 %v602_v25, %v2072_v29 }
 0x1a4   : > { %v604_v26 = vpop.f32.mrf.mxu0  ;;  %1351 = vmatprep.subr.mxu1 %v2383_v39 }
 0x1a5   : > { %v605_v14 = vadd.f32 %v604_v26, %v2075_v30  ;;  %863 = vmatprep.mubr.f32.mxu1 %v640_v11  ;;  %1383 = vmatpush2.msra.mxu1 %v2384_v40  ;;  %v641_v42 = vmax.f32 %v603_v13, 0.0 }
 0x1a6   : > { %v608_v41 = vpop.f32.mrf.mxu0  ;;  %864 = vmatmul.mubr.f32.gmra.mxu1 %v639_v38  ;;  %1352 = vmatprep.subr.mxu1 %v2385_v15 }
 0x1a7   : > { %v642_v28 = vmax.f32 %v605_v14, 0.0  ;;  %1384 = vmatpush2.msra.mxu1 %v2386_v17  ;;  %v609_v32 = vadd.f32 %v608_v41, %v2072_v29  ;;  %v950_v29 = vld [vmem:[#allocation8 + $0x120] sm:$0xff] }
 0x1a8   : > { %v610_v43 = vpop.f32.mrf.mxu0  ;;  %1353 = vmatprep.subr.mxu1 %v2387_v44  ;;  %1049 = vmatpush2.msra.mxu0 %v950_v29 }
 0x1a9   : > { %v611_v45 = vadd.f32 %v610_v43, %v2075_v30  ;;  %869 = vmatprep.mubr.f32.mxu1 %v642_v28  ;;  %1385 = vmatpush2.msra.mxu1 %v2388_v16  ;;  %v643_v21 = vmax.f32 %v609_v32, 0.0  ;;  %v949_v30 = vld [vmem:[#allocation8 + $0x118] sm:$0xff] }
 0x1aa   : > { %870 = vmatmul.mubr.f32.gmra.mxu1 %v641_v42  ;;  %1354 = vmatprep.subr.mxu1 %v953_v47 }
 0x1ab   : > { %v644_v46 = vmax.f32 %v611_v45, 0.0  ;;  %1386 = vmatpush2.msra.mxu1 %v952_v48  ;;  %1050 = vmatprep.subr.mxu0 %v949_v30 }
 0x1ac   : > { %1355 = vmatprep.subr.mxu1 %v951_v49  ;;  %1051 = vmatpush2.msra.mxu0 %v948_v27 }
 0x1ad   : > { %875 = vmatprep.mubr.f32.mxu1 %v644_v46  ;;  %1387 = vmatpush2.msra.mxu1 %v950_v29 }
 0x1ae   : > { %876 = vmatmul.mubr.f32.gmra.mxu1 %v643_v21  ;;  %1356 = vmatprep.subr.mxu1 %v949_v30 }
 0x1af   : > { %1388 = vmatpush2.msra.mxu1 %v948_v27  ;;  %1052 = vmatprep.subr.mxu0 %v947_v50 }
 0x1b0   : > { %1357 = vmatprep.subr.mxu1 %v947_v50  ;;  %1053 = vmatpush2.msra.mxu0 %v946_v31 }
 0x1b1   : > { %1389 = vmatpush2.msra.mxu1 %v946_v31 }
 0x232   : > { %v787_v22 = vpop.f32.mrf.mxu1 }
 0x233   : > { %v788_v55 = vadd.f32 %v787_v22, %v2168_v53 }
 0x234   : > { %v789_v56 = vpop.f32.mrf.mxu1 }
 0x235   : > { %v790_v57 = vadd.f32 %v789_v56, %v2171_v54  ;;  %v882_v24 = vmax.f32 %v788_v55, 0.0 }
 0x236   : > { %v793_v20 = vpop.f32.mrf.mxu1 }
 0x237   : > { %v883_v58 = vmax.f32 %v790_v57, 0.0  ;;  %v794_v59 = vadd.f32 %v793_v20, %v2168_v53 }
 0x238   : > { %v795_v60 = vpop.f32.mrf.mxu1 }
 0x239   : > { %v796_v61 = vadd.f32 %v795_v60, %v2171_v54  ;;  %1054 = vmatprep.mubr.f32.mxu0 %v883_v58  ;;  %v884_v19 = vmax.f32 %v794_v59, 0.0 }
 0x23a   : > { %v799_v33 = vpop.f32.mrf.mxu1  ;;  %1055 = vmatmul.mubr.f32.vlgmr.msra.gmra.mxu0 %v882_v24 }
 0x23b   : > { %v885_v62 = vmax.f32 %v796_v61, 0.0  ;;  %v800_v63 = vadd.f32 %v799_v33, %v2168_v53 }
 0x23c   : > { %v801_v0 = vpop.f32.mrf.mxu1 }
 0x23d   : > { %v802_v1 = vadd.f32 %v801_v0, %v2171_v54  ;;  %1060 = vmatprep.mubr.f32.mxu0 %v885_v62  ;;  %v886_v18 = vmax.f32 %v800_v63, 0.0 }
 0x23e   : > { %v805_v34 = vpop.f32.mrf.mxu1  ;;  %1061 = vmatmul.mubr.f32.gmra.mxu0 %v884_v19 }
 0x23f   : > { %v887_v2 = vmax.f32 %v802_v1, 0.0  ;;  %v806_v3 = vadd.f32 %v805_v34, %v2168_v53 }
 0x240   : > { %v807_v4 = vpop.f32.mrf.mxu1 }
 0x241   : > { %v808_v5 = vadd.f32 %v807_v4, %v2171_v54  ;;  %1066 = vmatprep.mubr.f32.mxu0 %v887_v2  ;;  %v888_v36 = vmax.f32 %v806_v3, 0.0 }
 0x242   : > { %v811_v35 = vpop.f32.mrf.mxu1  ;;  %1067 = vmatmul.mubr.f32.gmra.mxu0 %v886_v18 }
 0x243   : > { %v889_v6 = vmax.f32 %v808_v5, 0.0  ;;  %v812_v7 = vadd.f32 %v811_v35, %v2168_v53 }
 0x244   : > { %v813_v8 = vpop.f32.mrf.mxu1 }
 0x245   : > { %v814_v9 = vadd.f32 %v813_v8, %v2171_v54  ;;  %1072 = vmatprep.mubr.f32.mxu0 %v889_v6  ;;  %v890_v25 = vmax.f32 %v812_v7, 0.0 }
 0x246   : > { %v817_v37 = vpop.f32.mrf.mxu1  ;;  %1073 = vmatmul.mubr.f32.gmra.mxu0 %v888_v36 }
 0x247   : > { %v891_v10 = vmax.f32 %v814_v9, 0.0  ;;  %v818_v11 = vadd.f32 %v817_v37, %v2168_v53 }
 0x248   : > { %v819_v12 = vpop.f32.mrf.mxu1 }
 0x249   : > { %v820_v38 = vadd.f32 %v819_v12, %v2171_v54  ;;  %1078 = vmatprep.mubr.f32.mxu0 %v891_v10  ;;  %v892_v39 = vmax.f32 %v818_v11, 0.0 }
 0x24a   : > { %v823_v13 = vpop.f32.mrf.mxu1  ;;  %1079 = vmatmul.mubr.f32.gmra.mxu0 %v890_v25 }
 0x24b   : > { %v893_v26 = vmax.f32 %v820_v38, 0.0  ;;  %v824_v14 = vadd.f32 %v823_v13, %v2168_v53 }
 0x24c   : > { %v825_v40 = vpop.f32.mrf.mxu1 }
 0x24d   : > { %v826_v41 = vadd.f32 %v825_v40, %v2171_v54  ;;  %1084 = vmatprep.mubr.f32.mxu0 %v893_v26  ;;  %v894_v17 = vmax.f32 %v824_v14, 0.0 }
 0x24e   : > { %v829_v15 = vpop.f32.mrf.mxu1  ;;  %1085 = vmatmul.mubr.f32.gmra.mxu0 %v892_v39  ;;  %v978_v39 = vld [vmem:[%s2338_s6] sm:$0x3] }
 0x24f   : > { %v895_v28 = vmax.f32 %v826_v41, 0.0  ;;  %v830_v42 = vadd.f32 %v829_v15, %v2168_v53  ;;  %v2209_v14 = vrot.slane %v978_v39, %v2389_v52  ;;  %v2212_v40 = vrot.slane %v978_v39, %v2390_v23 }
 0x250   : > { %v831_v32 = vpop.f32.mrf.mxu1 }
 0x251   : > { %v832_v43 = vadd.f32 %v831_v32, %v2171_v54  ;;  %1090 = vmatprep.mubr.f32.mxu0 %v895_v28  ;;  %v896_v16 = vmax.f32 %v830_v42, 0.0 }
 0x252   : > { %v835_v44 = vpop.f32.mrf.mxu1  ;;  %1091 = vmatmul.mubr.f32.gmra.mxu0 %v894_v17 }
 0x253   : > { %v897_v45 = vmax.f32 %v832_v43, 0.0  ;;  %v836_v46 = vadd.f32 %v835_v44, %v2168_v53 }
 0x254   : > { %v837_v21 = vpop.f32.mrf.mxu1 }
 0x255   : > { %v838_v47 = vadd.f32 %v837_v21, %v2171_v54  ;;  %1096 = vmatprep.mubr.f32.mxu0 %v897_v45  ;;  %v898_v29 = vmax.f32 %v836_v46, 0.0 }
 0x256   : > { %v841_v48 = vpop.f32.mrf.mxu1  ;;  %1097 = vmatmul.mubr.f32.gmra.mxu0 %v896_v16 }
 0x257   : > { %v899_v49 = vmax.f32 %v838_v47, 0.0  ;;  %v842_v30 = vadd.f32 %v841_v48, %v2168_v53 }
 0x258   : > { %v843_v27 = vpop.f32.mrf.mxu1 }
 0x259   : > { %v844_v50 = vadd.f32 %v843_v27, %v2171_v54  ;;  %1102 = vmatprep.mubr.f32.mxu1 %v899_v49  ;;  %v900_v22 = vmax.f32 %v842_v30, 0.0 }
 0x25a   : > { %v847_v31 = vpop.f32.mrf.mxu1  ;;  %1103 = vmatmul.mubr.f32.vlgmr.msra.gmra.mxu1 %v898_v29 }
 0x25b   : > { %v901_v51 = vmax.f32 %v844_v50, 0.0  ;;  %v848_v55 = vadd.f32 %v847_v31, %v2168_v53 }
 0x25c   : > { %v849_v56 = vpop.f32.mrf.mxu1 }
 0x25d   : > { %v850_v57 = vadd.f32 %v849_v56, %v2171_v54  ;;  %1108 = vmatprep.mubr.f32.mxu1 %v901_v51  ;;  %v902_v24 = vmax.f32 %v848_v55, 0.0 }
 0x25e   : > { %v853_v20 = vpop.f32.mrf.mxu1  ;;  %1109 = vmatmul.mubr.f32.gmra.mxu1 %v900_v22 }
 0x25f   : > { %v903_v58 = vmax.f32 %v850_v57, 0.0  ;;  %v854_v59 = vadd.f32 %v853_v20, %v2168_v53 }
 0x260   : > { %v855_v60 = vpop.f32.mrf.mxu1 }
 0x261   : > { %v856_v61 = vadd.f32 %v855_v60, %v2171_v54  ;;  %1114 = vmatprep.mubr.f32.mxu1 %v903_v58  ;;  %v904_v19 = vmax.f32 %v854_v59, 0.0 }
 0x262   : > { %v859_v33 = vpop.f32.mrf.mxu1  ;;  %1115 = vmatmul.mubr.f32.gmra.mxu1 %v902_v24 }
 0x263   : > { %v905_v62 = vmax.f32 %v856_v61, 0.0  ;;  %v860_v63 = vadd.f32 %v859_v33, %v2168_v53 }
 0x264   : > { %v861_v0 = vpop.f32.mrf.mxu1 }
 0x265   : > { %v862_v1 = vadd.f32 %v861_v0, %v2171_v54  ;;  %1120 = vmatprep.mubr.f32.mxu1 %v905_v62  ;;  %v906_v18 = vmax.f32 %v860_v63, 0.0 }
 0x266   : > { %v865_v34 = vpop.f32.mrf.mxu1  ;;  %1121 = vmatmul.mubr.f32.gmra.mxu1 %v904_v19 }
 0x267   : > { %v907_v2 = vmax.f32 %v862_v1, 0.0  ;;  %v866_v3 = vadd.f32 %v865_v34, %v2168_v53 }
 0x268   : > { %v867_v4 = vpop.f32.mrf.mxu1 }
 0x269   : > { %v868_v5 = vadd.f32 %v867_v4, %v2171_v54  ;;  %1126 = vmatprep.mubr.f32.mxu1 %v907_v2  ;;  %v908_v36 = vmax.f32 %v866_v3, 0.0 }
 0x26a   : > { %v871_v35 = vpop.f32.mrf.mxu1  ;;  %1127 = vmatmul.mubr.f32.gmra.mxu1 %v906_v18 }
 0x26b   : > { %v909_v6 = vmax.f32 %v868_v5, 0.0  ;;  %v872_v7 = vadd.f32 %v871_v35, %v2168_v53 }
 0x26c   : > { %v873_v8 = vpop.f32.mrf.mxu1 }
 0x26d   : > { %v874_v9 = vadd.f32 %v873_v8, %v2171_v54  ;;  %1132 = vmatprep.mubr.f32.mxu1 %v909_v6  ;;  %v910_v25 = vmax.f32 %v872_v7, 0.0 }
 0x26e   : > { %v877_v37 = vpop.f32.mrf.mxu1  ;;  %1133 = vmatmul.mubr.f32.gmra.mxu1 %v908_v36 }
 0x26f   : > { %v911_v10 = vmax.f32 %v874_v9, 0.0  ;;  %v878_v11 = vadd.f32 %v877_v37, %v2168_v53 }
 0x270   : > { %v879_v12 = vpop.f32.mrf.mxu1 }
 0x271   : > { %v880_v38 = vadd.f32 %v879_v12, %v2171_v54  ;;  %1138 = vmatprep.mubr.f32.mxu1 %v911_v10  ;;  %v912_v26 = vmax.f32 %v878_v11, 0.0 }
 0x272   : > { %1139 = vmatmul.mubr.f32.gmra.mxu1 %v910_v25 }
 0x273   : > { %v913_v13 = vmax.f32 %v880_v38, 0.0 }
 0x275   : > { %1144 = vmatprep.mubr.f32.mxu1 %v913_v13 }
 0x276   : > { %1145 = vmatmul.mubr.f32.gmra.mxu1 %v912_v26 }
 0x2fa   : > { %v1056_v53 = vpop.f32.mrf.mxu0 }
 0x2fb   : > { %v1057_v41 = vadd.f32 %v1056_v53, %v2209_v14 }
 0x2fc   : > { %v1058_v54 = vpop.f32.mrf.mxu0 }
 0x2fd   : > { %1151 = vst [vmem:[%s2217_s11] sm:$0xff] %v1057_v41  ;;  %v1059_v52 = vadd.f32 %v1058_v54, %v2212_v40 }
 0x2fe   : > { %v1062_v15 = vpop.f32.mrf.mxu0 }
 0x2ff   : > { %1152 = vst [vmem:[%s2217_s11 + $0x8] sm:$0xff] %v1059_v52  ;;  %v1063_v23 = vadd.f32 %v1062_v15, %v2209_v14 }
 0x300   : > { %v1064_v28 = vpop.f32.mrf.mxu0 }
 0x301   : > { %1153 = vst [vmem:[%s2217_s11 + $0x10] sm:$0xff] %v1063_v23  ;;  %v1065_v17 = vadd.f32 %v1064_v28, %v2212_v40 }
 0x302   : > { %v1068_v42 = vpop.f32.mrf.mxu0 }
 0x303   : > { %1154 = vst [vmem:[%s2217_s11 + $0x18] sm:$0xff] %v1065_v17  ;;  %v1069_v32 = vadd.f32 %v1068_v42, %v2209_v14 }
 0x304   : > { %v1070_v43 = vpop.f32.mrf.mxu0 }
 0x305   : > { %1155 = vst [vmem:[%s2217_s11 + $0x20] sm:$0xff] %v1069_v32  ;;  %v1071_v44 = vadd.f32 %v1070_v43, %v2212_v40 }
 0x306   : > { %v1074_v45 = vpop.f32.mrf.mxu0 }
 0x307   : > { %1156 = vst [vmem:[%s2217_s11 + $0x28] sm:$0xff] %v1071_v44  ;;  %v1075_v16 = vadd.f32 %v1074_v45, %v2209_v14 }
 0x308   : > { %v1076_v46 = vpop.f32.mrf.mxu0 }
 0x309   : > { %1157 = vst [vmem:[%s2217_s11 + $0x30] sm:$0xff] %v1075_v16  ;;  %v1077_v21 = vadd.f32 %v1076_v46, %v2212_v40 }
 0x30a   : > { %v1080_v47 = vpop.f32.mrf.mxu0 }
 0x30b   : > { %1158 = vst [vmem:[%s2217_s11 + $0x38] sm:$0xff] %v1077_v21  ;;  %v1081_v48 = vadd.f32 %v1080_v47, %v2209_v14 }
 0x30c   : > { %v1082_v49 = vpop.f32.mrf.mxu0 }
 0x30d   : > { %1159 = vst [vmem:[%s2217_s11 + $0x40] sm:$0xff] %v1081_v48  ;;  %v1083_v29 = vadd.f32 %v1082_v49, %v2212_v40 }
 0x30e   : > { %v1086_v30 = vpop.f32.mrf.mxu0 }
 0x30f   : > { %1160 = vst [vmem:[%s2217_s11 + $0x48] sm:$0xff] %v1083_v29  ;;  %v1087_v27 = vadd.f32 %v1086_v30, %v2209_v14 }
 0x310   : > { %v1088_v50 = vpop.f32.mrf.mxu0 }
 0x311   : > { %1161 = vst [vmem:[%s2217_s11 + $0x50] sm:$0xff] %v1087_v27  ;;  %v1089_v31 = vadd.f32 %v1088_v50, %v2212_v40 }
 0x312   : > { %v1092_v51 = vpop.f32.mrf.mxu0 }
 0x313   : > { %1162 = vst [vmem:[%s2217_s11 + $0x58] sm:$0xff] %v1089_v31  ;;  %v1093_v22 = vadd.f32 %v1092_v51, %v2209_v14 }
 0x314   : > { %v1094_v55 = vpop.f32.mrf.mxu0 }
 0x315   : > { %1163 = vst [vmem:[%s2217_s11 + $0x60] sm:$0xff] %v1093_v22  ;;  %v1095_v56 = vadd.f32 %v1094_v55, %v2212_v40 }
 0x316   : > { %v1098_v57 = vpop.f32.mrf.mxu0 }
 0x317   : > { %1164 = vst [vmem:[%s2217_s11 + $0x68] sm:$0xff] %v1095_v56  ;;  %v1099_v20 = vadd.f32 %v1098_v57, %v2209_v14 }
 0x318   : > { %v1100_v58 = vpop.f32.mrf.mxu0 }
 0x319   : > { %1165 = vst [vmem:[%s2217_s11 + $0x70] sm:$0xff] %v1099_v20  ;;  %v1101_v24 = vadd.f32 %v1100_v58, %v2212_v40 }
 0x31a   : > { %v1104_v59 = vpop.f32.mrf.mxu1 }
 0x31b   : > { %1166 = vst [vmem:[%s2217_s11 + $0x78] sm:$0xff] %v1101_v24  ;;  %v1105_v60 = vadd.f32 %v1104_v59, %v2209_v14 }
 0x31c   : > { %v1106_v61 = vpop.f32.mrf.mxu1 }
 0x31d   : > { %1167 = vst [vmem:[%s2217_s11 + $0x80] sm:$0xff] %v1105_v60  ;;  %v1107_v33 = vadd.f32 %v1106_v61, %v2212_v40 }
 0x31e   : > { %v1110_v62 = vpop.f32.mrf.mxu1 }
 0x31f   : > { %1168 = vst [vmem:[%s2217_s11 + $0x88] sm:$0xff] %v1107_v33  ;;  %v1111_v19 = vadd.f32 %v1110_v62, %v2209_v14 }
 0x320   : > { %v1112_v63 = vpop.f32.mrf.mxu1 }
 0x321   : > { %1169 = vst [vmem:[%s2217_s11 + $0x90] sm:$0xff] %v1111_v19  ;;  %v1113_v0 = vadd.f32 %v1112_v63, %v2212_v40 }
 0x322   : > { %v1116_v1 = vpop.f32.mrf.mxu1 }
 0x323   : > { %1170 = vst [vmem:[%s2217_s11 + $0x98] sm:$0xff] %v1113_v0  ;;  %v1117_v34 = vadd.f32 %v1116_v1, %v2209_v14 }
 0x324   : > { %v1118_v2 = vpop.f32.mrf.mxu1 }
 0x325   : > { %1171 = vst [vmem:[%s2217_s11 + $0xa0] sm:$0xff] %v1117_v34  ;;  %v1119_v18 = vadd.f32 %v1118_v2, %v2212_v40 }
 0x326   : > { %v1122_v3 = vpop.f32.mrf.mxu1 }
 0x327   : > { %1172 = vst [vmem:[%s2217_s11 + $0xa8] sm:$0xff] %v1119_v18  ;;  %v1123_v4 = vadd.f32 %v1122_v3, %v2209_v14 }
 0x328   : > { %v1124_v5 = vpop.f32.mrf.mxu1 }
 0x329   : > { %1173 = vst [vmem:[%s2217_s11 + $0xb0] sm:$0xff] %v1123_v4  ;;  %v1125_v35 = vadd.f32 %v1124_v5, %v2212_v40 }
 0x32a   : > { %v1128_v6 = vpop.f32.mrf.mxu1 }
 0x32b   : > { %1174 = vst [vmem:[%s2217_s11 + $0xb8] sm:$0xff] %v1125_v35  ;;  %v1129_v36 = vadd.f32 %v1128_v6, %v2209_v14 }
 0x32c   : > { %v1130_v7 = vpop.f32.mrf.mxu1 }
 0x32d   : > { %1175 = vst [vmem:[%s2217_s11 + $0xc0] sm:$0xff] %v1129_v36  ;;  %v1131_v8 = vadd.f32 %v1130_v7, %v2212_v40 }
 0x32e   : > { %v1134_v9 = vpop.f32.mrf.mxu1 }
 0x32f   : > { %1176 = vst [vmem:[%s2217_s11 + $0xc8] sm:$0xff] %v1131_v8  ;;  %v1135_v37 = vadd.f32 %v1134_v9, %v2209_v14 }
 0x330   : > { %v1136_v10 = vpop.f32.mrf.mxu1 }
 0x331   : > { %1177 = vst [vmem:[%s2217_s11 + $0xd0] sm:$0xff] %v1135_v37  ;;  %v1137_v25 = vadd.f32 %v1136_v10, %v2212_v40 }
 0x332   : > { %v1140_v11 = vpop.f32.mrf.mxu1 }
 0x333   : > { %1178 = vst [vmem:[%s2217_s11 + $0xd8] sm:$0xff] %v1137_v25  ;;  %v1141_v12 = vadd.f32 %v1140_v11, %v2209_v14 }
 0x334   : > { %v1142_v38 = vpop.f32.mrf.mxu1 }
 0x335   : > { %1179 = vst [vmem:[%s2217_s11 + $0xe0] sm:$0xff] %v1141_v12  ;;  %v1143_v13 = vadd.f32 %v1142_v38, %v2212_v40 }
 0x336   : > { %v1146_v26 = vpop.f32.mrf.mxu1 }
 0x337   : > { %1180 = vst [vmem:[%s2217_s11 + $0xe8] sm:$0xff] %v1143_v13  ;;  %v1147_v39 = vadd.f32 %v1146_v26, %v2209_v14 }
 0x338   : > { %v1148_v53 = vpop.f32.mrf.mxu1 }
 0x339   : > { %1181 = vst [vmem:[%s2217_s11 + $0xf0] sm:$0xff] %v1147_v39  ;;  %v1149_v41 = vadd.f32 %v1148_v53, %v2212_v40 }
 0x33b   : > { %1182 = vst [vmem:[%s2217_s11 + $0xf8] sm:$0xff] %v1149_v41 }
 0x33c   : > { %1590 = shalt.err (!%p1587_p10)
}
 0x33d   : > { %s1591_s10 = scalar_lea.hbm %s2284_s1, 4096  ;;  %s1595_s29 = scalar_lea.hbm %s2339_s7, 8192 }
 0x33e   : > { %p1592_p6 = scmp.ne.s32.totalorder %s2284_s1, %s1591_s10  ;;  %p1596_p3 = scmp.lt.s32.totalorder %s2284_s1, %s2339_s7 }
 0x33f   : > { %p1597_p11 = scmp.lt.s32.totalorder %s1595_s29, %s1591_s10 }
 0x340   : > { %p1593_p4 = pnand %p1592_p6, %p2391_p1 }
 0x341   : > { %p1598_p5 = por %p1597_p11, %p1596_p3 }
 0x342   : > { %p1594_p8 = pneg %p1593_p4 }
 0x344   : > { %p1599_p7 = pnand %p1598_p5, %p1594_p8 }
 0x346   : > { %1602 = shalt.err (!%p1599_p7)
}
 0x347   : > { %s1658_s18 = smov 256   ;;  %s1659_s23 = smov 16  }
 0x348   : > { %1404 = dma.vmem_to_hbm [thread:$0]  (%p2391_p1), %s2286_s22, 4096, %s2284_s1, %s1184_s28, %s1658_s18, %s1658_s18, %s1659_s23  }
 0x349 PF: > { %s1213_s16 = sand.u32 1, %s1637_s24   ;;  %p2392_p12 = scmp.ne.s32.totalorder %s2359_s8, 0 }
 0x34a   : > { %p2393_p9 = scmp.ge.s32.totalorder %s1649_s27, 2  ;;  %s1214_s12 = scalar_lea.sflag [#allocation4], %s1213_s16 }
 0x34c   : > { %p1421_p13 = pnand %p2393_p9, %p2392_p12 }
 0x34e   : > { %p1422_p0 = pneg %p1421_p13 }
 0x350   : > { %1632 = dma.done.wait (%p1422_p0), %s1214_s12, 4096  }
 0x351   : > { %1634 = vsyncadd (%p1422_p0), %s1214_s12, 4294963200  ;;  %p22_p2 = scmp.ge.s32.totalorder %s1789_s14, 4   ;;  %s2394_s24 = smov %s1641_s25 }
 0x352   : > { %s2395_s25 = smov %s1645_s26  ;;  %s2396_s26 = smov %s1799_s17 }
 0x353   : > { %s2397_s27 = smov %s1789_s14  ;;  %24 = sbr.rel (!%p22_p2) target bundleno = 9 (0x9), region = 105 }
 0x358   :  { %1219 = vsyncpa [#allocation3], 1 }
 0x359   :  { %1221 = vsyncpa [#allocation3 + $0x1], 1 }
 0x35a   :  { %1222 = vsyncpa [#allocation6], 1 }
 0x35b   :  { %1223 = vsyncpa [#allocation9], 1 }
 0x35c   :  { %1224 = vsyncpa [#allocation4], 1 }
 0x35d   :  { %1226 = vsyncpa [#allocation4 + $0x1], 1 }

</bundles_post_ra>
